<compile_context>
chip_gen: v7x
topology: tpu7x:2x2x1
jax: 0.10.0
libtpu: 0.0.40
codegen_flags: <defaults>
</compile_context>

<pallas_src>
import functools

import jax
import jax.numpy as jnp
import numpy as np
from jax import lax
from jax.experimental import pallas as pl
from jax.experimental.pallas import tpu as pltpu

# ---------------- sizes (small, consistent with the module) ----------------
B = 4      # batch
BP = 8     # batch padded to a full sublane tile inside the kernel
T = 8      # target sequence length
E = 64     # emb_size
H = 64     # dec_hid_size
S = 64     # ses_hid_size
V = 128    # vocab_size
TB = T * BP

# fused input projection columns: [r | z | n | pad | emb_even | emb_odd]
XCOLS = 6 * H          # 384
EMB_OFF = 4 * H        # 256 (lane-aligned start of the emb_inf halves)
# hidden-side GRU gate columns: [r | z | n | pad]
GC = 4 * H             # 256
# session projection columns: [ses_even | ses_odd | ses_to_dec | pad]
SC = 4 * H             # 256
# packed 64-row weight slab column offsets: [wses | whh | wdec | wout]
WSES_OFF, WHH_OFF, WDEC_OFF, WOUT_OFF = 0, 256, 512, 640
W64_COLS = 768
# packed bias row: [bses (256) | b_hn (64) | pad (64)]
BHN_OFF = 256
BIAS_COLS = 384


# ------------------------------ Pallas kernel ------------------------------
def decoder_tc_kernel(
    tok_ref,     # [T*BP, 1] int32  time-major, batch-padded token ids
    ses_ref,     # [BP, S]          session encoding (batch-padded)
    wxf_ref,     # [V, XCOLS]       embed_in folded with input-side weights + bias
    w64_ref,     # [64, W64_COLS]   packed [wses | whh | wdec | wout]
    bias_ref,    # [1, BIAS_COLS]   packed [bses | b_hn | pad]
    out_ref,     # [T*BP, V]        output logits (time-major)
    xproj_ref,   # scratch [T*BP, XCOLS]
    hid_ref,     # scratch [T*BP, H]
):
    f32 = jnp.float32

    # --- hoisted: token one-hot -> input gates + emb_inf for ALL steps ------
    tok = tok_ref[...]                                               # [TB, 1]
    onehot = (tok == lax.broadcasted_iota(jnp.int32, (TB, V), 1)).astype(f32)
    xproj_ref[...] = jnp.dot(onehot, wxf_ref[...],
                             preferred_element_type=f32)             # [TB, XCOLS]

    # --- session-side work (once): h0 and ses_inf ---------------------------
    sesproj = (jnp.dot(ses_ref[...], w64_ref[:, WSES_OFF:WSES_OFF + SC],
                       preferred_element_type=f32)
               + bias_ref[:, 0:SC])                                  # [BP, SC]
    ses_inf = sesproj[:, 0:2 * E]                                    # [BP, 2E]
    h0 = jnp.tanh(sesproj[:, 2 * E:2 * E + H])                       # [BP, H]

    whh = w64_ref[:, WHH_OFF:WHH_OFF + GC]                           # [H, GC]
    bhn = bias_ref[:, BHN_OFF:BHN_OFF + H]                           # [1, H]

    # --- serial recurrence: only h-dependent work remains inside ------------
    def step(t, h):
        base = pl.multiple_of(t * BP, BP)
        xg = xproj_ref[pl.ds(base, BP), :]                           # [BP, XCOLS]
        gh = jnp.dot(h, whh, preferred_element_type=f32)             # [BP, GC]
        # fused r|z sigmoid: one 128-lane transcendental push
        rz = jax.nn.sigmoid(xg[:, 0:2 * H] + gh[:, 0:2 * H])
        r = rz[:, 0:H]
        z = rz[:, H:2 * H]
        # b_ir+b_hr, b_iz+b_hz, b_in are folded into xg; only b_hn stays here
        n = jnp.tanh(xg[:, 2 * H:3 * H] + r * (gh[:, 2 * H:3 * H] + bhn))
        h_new = (1.0 - z) * n + z * h                                # [BP, H]
        hid_ref[pl.ds(base, BP), :] = h_new
        return h_new

    lax.fori_loop(0, T, step, h0, unroll=True)

    # --- hoisted epilogue: dec_inf, adds, maxout, vocab projection ----------
    dec_inf = jnp.dot(hid_ref[...], w64_ref[:, WDEC_OFF:WDEC_OFF + 2 * E],
                      preferred_element_type=f32)                    # [TB, 2E]
    emb_inf = xproj_ref[:, EMB_OFF:EMB_OFF + 2 * E]                  # [TB, 2E]
    ses_rep = jnp.concatenate([ses_inf] * T, axis=0)                 # [TB, 2E]
    tot = dec_inf + ses_rep + emb_inf
    # max_out over consecutive channel pairs == max(even half, odd half)
    mx = jnp.maximum(tot[:, 0:E], tot[:, E:2 * E])                   # [TB, E]
    out_ref[...] = jnp.dot(mx, w64_ref[:, WOUT_OFF:WOUT_OFF + V],
                           preferred_element_type=f32)               # [TB, V]


# ------------------------------- parameters --------------------------------
def init_params(key):
    ks = jax.random.split(key, 9)
    scale = 0.1
    p = {
        "embed_in": jax.random.normal(ks[0], (V, E), jnp.float32) * scale,
        "W_s2d": jax.random.normal(ks[1], (H, S), jnp.float32) * scale,
        "b_s2d": jax.random.normal(ks[2], (H,), jnp.float32) * scale,
        "W_ih": jax.random.normal(ks[3], (3 * H, E), jnp.float32) * scale,
        "W_hh": jax.random.normal(ks[4], (3 * H, H), jnp.float32) * scale,
        "b_ih": jax.random.normal(ks[5], (3 * H,), jnp.float32) * scale,
        "b_hh": jax.random.normal(ks[6], (3 * H,), jnp.float32) * scale,
        "W_decinf": jax.random.normal(ks[7], (2 * E, H), jnp.float32) * scale,
        "W_sesinf": jax.random.normal(ks[8], (2 * E, S), jnp.float32) * scale,
        "W_embinf": jax.random.normal(jax.random.fold_in(key, 10), (2 * E, E),
                                      jnp.float32) * scale,
        "b_embinf": jax.random.normal(jax.random.fold_in(key, 11), (2 * E,),
                                      jnp.float32) * scale,
        "W_out": jax.random.normal(jax.random.fold_in(key, 12), (V, E),
                                   jnp.float32) * scale,
    }
    return p


def pack_decoder_weights(p):
    """PyTorch-convention params -> packed, lane-aligned kernel operands.

    Done once (outside the per-call jit): folds the embedding table into the
    input-side projection and folds b_hr / b_hz into the input-side bias.
    """
    hp = jax.lax.Precision.HIGHEST
    zEH = jnp.zeros((E, H), jnp.float32)
    zH = jnp.zeros((H,), jnp.float32)

    # input-side fused weights, columns [r | z | n | pad | emb_e | emb_o]
    wx = jnp.concatenate(
        [p["W_ih"][0:H].T, p["W_ih"][H:2 * H].T, p["W_ih"][2 * H:3 * H].T, zEH,
         p["W_embinf"][0::2].T, p["W_embinf"][1::2].T], axis=1)       # [E, XCOLS]
    bx = jnp.concatenate(
        [p["b_ih"][0:H] + p["b_hh"][0:H],          # b_ir + b_hr folded
         p["b_ih"][H:2 * H] + p["b_hh"][H:2 * H],  # b_iz + b_hz folded
         p["b_ih"][2 * H:3 * H], zH,
         p["b_embinf"][0::2], p["b_embinf"][1::2]])                   # [XCOLS]
    # fold the embedding table: row v = embed_in[v] @ wx + bx
    wxfold = jnp.dot(p["embed_in"], wx, precision=hp) + bx[None, :]   # [V, XCOLS]

    # session-side fused weights, columns [ses_e | ses_o | ses_to_dec | pad]
    wses = jnp.concatenate(
        [p["W_sesinf"][0::2].T, p["W_sesinf"][1::2].T, p["W_s2d"].T,
         jnp.zeros((S, H), jnp.float32)], axis=1)                     # [S, SC]
    # hidden-side GRU weights, columns [r | z | n | pad] (no bias here)
    whh = jnp.concatenate(
        [p["W_hh"][0:H].T, p["W_hh"][H:2 * H].T, p["W_hh"][2 * H:3 * H].T,
         jnp.zeros((H, H), jnp.float32)], axis=1)                     # [H, GC]
    # dec_inf maxout halves and output projection
    wdec = jnp.concatenate(
        [p["W_decinf"][0::2].T, p["W_decinf"][1::2].T], axis=1)       # [H, 2E]
    wout = p["W_out"].T                                               # [E, V]

    w64 = jnp.concatenate([wses, whh, wdec, wout], axis=1)            # [64, 768]

    bias = jnp.concatenate(
        [jnp.zeros((2 * E,), jnp.float32),   # ses_inf has no bias
         p["b_s2d"], zH,                     # ses_to_dec bias | pad
         p["b_hh"][2 * H:3 * H], zH]         # b_hn | pad
    ).reshape(1, BIAS_COLS)

    return {"wxfold": wxfold, "w64": w64, "bias": bias}


# --------------------------------- wrapper ---------------------------------
@jax.jit
def decoder_forward(packed, ses_encoding, target):
    """Decoder.forward((ses_encoding, x, x_lens)) teacher-forced path.

    packed: output of pack_decoder_weights; ses_encoding: [B, 1, S] float32;
    target: [B, T] int32.  Returns (dec_o [B, T, V], None).
    """
    # token ids: [B, T] -> time-major, batch padded -> [T*BP, 1] (tiny int ops)
    tok_tm = jnp.pad(target.astype(jnp.int32).T, ((0, 0), (0, BP - B)))
    tok = tok_tm.reshape(TB, 1)
    ses = jnp.pad(ses_encoding.reshape(B, S), ((0, BP - B), (0, 0)))  # [BP, S]

    vmem = pl.BlockSpec(memory_space=pltpu.MemorySpace.VMEM)
    logits = pl.pallas_call(
        decoder_tc_kernel,
        out_shape=jax.ShapeDtypeStruct((TB, V), jnp.float32),
        in_specs=[vmem] * 5,
        out_specs=vmem,
        scratch_shapes=[
            pltpu.VMEM((TB, XCOLS), jnp.float32),   # xproj
            pltpu.VMEM((TB, H), jnp.float32),       # hid_o
        ],
    )(tok, ses, packed["wxfold"], packed["w64"], packed["bias"])

    # fixed-cost wrapper epilogue: drop pad rows, back to batch-major [B, T, V]
    dec_o = jnp.transpose(logits.reshape(T, BP, V)[:, :B, :], (1, 0, 2))
    return dec_o, None


# ----------------------------- pure-JAX reference ---------------------------
def decoder_reference(p, ses_encoding, target):
    hp = jax.lax.Precision.HIGHEST
    dot = functools.partial(jnp.dot, precision=hp)
    emb = p["embed_in"][target]                                   # [B, T, E]
    ses = ses_encoding.reshape(ses_encoding.shape[0], S)
    emb_inf = dot(emb, p["W_embinf"].T) + p["b_embinf"]           # [B, T, 2E]
    h = jnp.tanh(dot(ses, p["W_s2d"].T) + p["b_s2d"])             # [B, H]
    ses_inf = dot(ses, p["W_sesinf"].T)                           # [B, 2E]
    hs = []
    for t in range(T):
        x = emb[:, t]
        gi = dot(x, p["W_ih"].T) + p["b_ih"]
        gh = dot(h, p["W_hh"].T) + p["b_hh"]
        r = jax.nn.sigmoid(gi[:, :H] + gh[:, :H])
        z = jax.nn.sigmoid(gi[:, H:2 * H] + gh[:, H:2 * H])
        n = jnp.tanh(gi[:, 2 * H:] + r * gh[:, 2 * H:])
        h = (1.0 - z) * n + z * h
        hs.append(h)
    hid_o = jnp.stack(hs, axis=1)                                 # [B, T, H]
    total = dot(hid_o, p["W_decinf"].T) + ses_inf[:, None, :] + emb_inf
    mx = jnp.max(total.reshape(B, T, E, 2), axis=-1)              # max_out
    return dot(mx, p["W_out"].T)                                  # [B, T, V]


# ----------------------------------- main -----------------------------------
if __name__ == "__main__":
    key = jax.random.PRNGKey(0)
    params = init_params(key)
    packed = pack_decoder_weights(params)   # weights-only, done once

    k1, k2 = jax.random.split(jax.random.fold_in(key, 99))
    ses_encoding = jax.random.normal(k1, (B, 1, S), jnp.float32)
    target = jax.random.randint(k2, (B, T), 0, V, jnp.int32)
    # target_lens: all full length (see TODO on pack_padded_sequence)

    dec_o, dec_lm = decoder_forward(packed, ses_encoding, target)
    dec_o = jax.block_until_ready(dec_o)

    ref = decoder_reference(params, ses_encoding, target)
    # kernel uses single-pass MXU (default precision); reference is f32-highest
    np.testing.assert_allclose(np.asarray(dec_o), np.asarray(ref),
                               rtol=2e-2, atol=2e-2)

    assert dec_o.shape == (B, T, V) and dec_lm is None
    print("KERNEL_OK")
</pallas_src>

<mosaic_0001>
module attributes {stable_mosaic.version = 11 : i64} {
  func.func @decoder_tc_kernel(%arg0: memref<64x1xi32, #tpu.memory_space<vmem>>, %arg1: memref<8x64xf32, #tpu.memory_space<vmem>>, %arg2: memref<128x384xf32, #tpu.memory_space<vmem>>, %arg3: memref<64x768xf32, #tpu.memory_space<vmem>>, %arg4: memref<1x384xf32, #tpu.memory_space<vmem>>, %arg5: memref<64x128xf32, #tpu.memory_space<vmem>>, %arg6: memref<64x384xf32, #tpu.memory_space<vmem>>, %arg7: memref<64x64xf32, #tpu.memory_space<vmem>>) attributes {dimension_semantics = [], scalar_prefetch = 0 : i64, scratch_operands = 2 : i64, tpu.core_type = #tpu.core_type<tc>} {
    %c0 = arith.constant 0 : index
    %c0_0 = arith.constant 0 : index
    %0 = vector.load %arg0[%c0, %c0_0] : memref<64x1xi32, #tpu.memory_space<vmem>>, vector<64x1xi32>
    %1 = tpu.iota {dimensions = array<i32: 1>} : vector<64x128xi32>
    %2 = vector.broadcast %0 : vector<64x1xi32> to vector<64x128xi32>
    %3 = arith.cmpi eq, %2, %1 : vector<64x128xi32>
    %4 = arith.extui %3 : vector<64x128xi1> to vector<64x128xi32>
    %5 = arith.sitofp %4 : vector<64x128xi32> to vector<64x128xf32>
    %c0_1 = arith.constant 0 : index
    %c0_2 = arith.constant 0 : index
    %6 = vector.load %arg2[%c0_1, %c0_2] : memref<128x384xf32, #tpu.memory_space<vmem>>, vector<128x384xf32>
    %cst = arith.constant dense<0.000000e+00> : vector<64x384xf32>
    %7 = tpu.matmul %5, %6, %cst {dimension_numbers = #tpu.dot_dimension_numbers<[1], [0], [0], [1], [0, 0, 1, 1], [], []>} : vector<64x128xf32>, vector<128x384xf32>, vector<64x384xf32> -> vector<64x384xf32>
    %c0_3 = arith.constant 0 : index
    %c0_4 = arith.constant 0 : index
    %8 = vector.load %arg6[%c0_3, %c0_4] : memref<64x384xf32, #tpu.memory_space<vmem>>, vector<64x384xf32>
    tpu.vector_store %arg6[%c0_3, %c0_4], %7 {strides = array<i32>} : memref<64x384xf32, #tpu.memory_space<vmem>>, vector<64x384xf32>,
    %c0_5 = arith.constant 0 : index
    %c0_6 = arith.constant 0 : index
    %9 = vector.load %arg1[%c0_5, %c0_6] : memref<8x64xf32, #tpu.memory_space<vmem>>, vector<8x64xf32>
    %c0_7 = arith.constant 0 : index
    %c0_8 = arith.constant 0 : index
    %10 = vector.load %arg3[%c0_7, %c0_8] : memref<64x768xf32, #tpu.memory_space<vmem>>, vector<64x256xf32>
    %cst_9 = arith.constant dense<0.000000e+00> : vector<8x256xf32>
    %11 = tpu.matmul %9, %10, %cst_9 {dimension_numbers = #tpu.dot_dimension_numbers<[1], [0], [0], [1], [0, 0, 1, 1], [], []>} : vector<8x64xf32>, vector<64x256xf32>, vector<8x256xf32> -> vector<8x256xf32>
    %c0_10 = arith.constant 0 : index
    %c0_11 = arith.constant 0 : index
    %12 = vector.load %arg4[%c0_10, %c0_11] : memref<1x384xf32, #tpu.memory_space<vmem>>, vector<1x256xf32>
    %13 = vector.broadcast %12 : vector<1x256xf32> to vector<8x256xf32>
    %14 = arith.addf %11, %13 : vector<8x256xf32>
    %15 = vector.extract_strided_slice %14 {offsets = [0, 0], sizes = [8, 128], strides = [1, 1]} : vector<8x256xf32> to vector<8x128xf32>
    %16 = vector.extract_strided_slice %14 {offsets = [0, 128], sizes = [8, 64], strides = [1, 1]} : vector<8x256xf32> to vector<8x64xf32>
    %17 = math.tanh %16 : vector<8x64xf32>
    %c0_12 = arith.constant 0 : index
    %c256 = arith.constant 256 : index
    %18 = vector.load %arg3[%c0_12, %c256] : memref<64x768xf32, #tpu.memory_space<vmem>>, vector<64x256xf32>
    %c0_13 = arith.constant 0 : index
    %c256_14 = arith.constant 256 : index
    %19 = vector.load %arg4[%c0_13, %c256_14] : memref<1x384xf32, #tpu.memory_space<vmem>>, vector<1x64xf32>
    %c0_i32 = arith.constant 0 : i32
    %c8_i32 = arith.constant 8 : i32
    %20 = arith.muli %c0_i32, %c8_i32 : i32
    %21 = tpu.assume_multiple %20, 8 : i32
    %22 = arith.index_cast %21 : i32 to index
    %c0_15 = arith.constant 0 : index
    %23 = vector.load %arg6[%22, %c0_15] : memref<64x384xf32, #tpu.memory_space<vmem>>, vector<8x384xf32>
    %cst_16 = arith.constant dense<0.000000e+00> : vector<8x256xf32>
    %24 = tpu.matmul %17, %18, %cst_16 {dimension_numbers = #tpu.dot_dimension_numbers<[1], [0], [0], [1], [0, 0, 1, 1], [], []>} : vector<8x64xf32>, vector<64x256xf32>, vector<8x256xf32> -> vector<8x256xf32>
    %25 = vector.extract_strided_slice %23 {offsets = [0, 0], sizes = [8, 128], strides = [1, 1]} : vector<8x384xf32> to vector<8x128xf32>
    %26 = vector.extract_strided_slice %24 {offsets = [0, 0], sizes = [8, 128], strides = [1, 1]} : vector<8x256xf32> to vector<8x128xf32>
    %27 = arith.addf %25, %26 : vector<8x128xf32>
    %28 = arith.negf %27 : vector<8x128xf32>
    %29 = math.exp %28 : vector<8x128xf32>
    %cst_17 = arith.constant 1.000000e+00 : f32
    %30 = vector.broadcast %cst_17 : f32 to vector<8x128xf32>
    %31 = arith.addf %30, %29 : vector<8x128xf32>
    %32 = arith.divf %30, %31 : vector<8x128xf32>
    %33 = vector.extract_strided_slice %32 {offsets = [0, 0], sizes = [8, 64], strides = [1, 1]} : vector<8x128xf32> to vector<8x64xf32>
    %34 = vector.extract_strided_slice %32 {offsets = [0, 64], sizes = [8, 64], strides = [1, 1]} : vector<8x128xf32> to vector<8x64xf32>
    %35 = vector.extract_strided_slice %23 {offsets = [0, 128], sizes = [8, 64], strides = [1, 1]} : vector<8x384xf32> to vector<8x64xf32>
    %36 = vector.extract_strided_slice %24 {offsets = [0, 128], sizes = [8, 64], strides = [1, 1]} : vector<8x256xf32> to vector<8x64xf32>
    %37 = vector.broadcast %19 : vector<1x64xf32> to vector<8x64xf32>
    %38 = arith.addf %36, %37 : vector<8x64xf32>
    %39 = arith.mulf %33, %38 : vector<8x64xf32>
    %40 = arith.addf %35, %39 : vector<8x64xf32>
    %41 = math.tanh %40 : vector<8x64xf32>
    %cst_18 = arith.constant 1.000000e+00 : f32
    %42 = vector.broadcast %cst_18 : f32 to vector<8x64xf32>
    %43 = arith.subf %42, %34 : vector<8x64xf32>
    %44 = arith.mulf %43, %41 : vector<8x64xf32>
    %45 = arith.mulf %34, %17 : vector<8x64xf32>
    %46 = arith.addf %44, %45 : vector<8x64xf32>
    %47 = arith.index_cast %21 : i32 to index
    %c0_19 = arith.constant 0 : index
    %48 = vector.load %arg7[%47, %c0_19] : memref<64x64xf32, #tpu.memory_space<vmem>>, vector<8x64xf32>
    tpu.vector_store %arg7[%47, %c0_19], %46 {strides = array<i32>} : memref<64x64xf32, #tpu.memory_space<vmem>>, vector<8x64xf32>,
    %c1_i32 = arith.constant 1 : i32
    %c8_i32_20 = arith.constant 8 : i32
    %49 = arith.muli %c1_i32, %c8_i32_20 : i32
    %50 = tpu.assume_multiple %49, 8 : i32
    %51 = arith.index_cast %50 : i32 to index
    %c0_21 = arith.constant 0 : index
    %52 = vector.load %arg6[%51, %c0_21] : memref<64x384xf32, #tpu.memory_space<vmem>>, vector<8x384xf32>
    %cst_22 = arith.constant dense<0.000000e+00> : vector<8x256xf32>
    %53 = tpu.matmul %46, %18, %cst_22 {dimension_numbers = #tpu.dot_dimension_numbers<[1], [0], [0], [1], [0, 0, 1, 1], [], []>} : vector<8x64xf32>, vector<64x256xf32>, vector<8x256xf32> -> vector<8x256xf32>
    %54 = vector.extract_strided_slice %52 {offsets = [0, 0], sizes = [8, 128], strides = [1, 1]} : vector<8x384xf32> to vector<8x128xf32>
    %55 = vector.extract_strided_slice %53 {offsets = [0, 0], sizes = [8, 128], strides = [1, 1]} : vector<8x256xf32> to vector<8x128xf32>
    %56 = arith.addf %54, %55 : vector<8x128xf32>
    %57 = arith.negf %56 : vector<8x128xf32>
    %58 = math.exp %57 : vector<8x128xf32>
    %cst_23 = arith.constant 1.000000e+00 : f32
    %59 = vector.broadcast %cst_23 : f32 to vector<8x128xf32>
    %60 = arith.addf %59, %58 : vector<8x128xf32>
    %61 = arith.divf %59, %60 : vector<8x128xf32>
    %62 = vector.extract_strided_slice %61 {offsets = [0, 0], sizes = [8, 64], strides = [1, 1]} : vector<8x128xf32> to vector<8x64xf32>
    %63 = vector.extract_strided_slice %61 {offsets = [0, 64], sizes = [8, 64], strides = [1, 1]} : vector<8x128xf32> to vector<8x64xf32>
    %64 = vector.extract_strided_slice %52 {offsets = [0, 128], sizes = [8, 64], strides = [1, 1]} : vector<8x384xf32> to vector<8x64xf32>
    %65 = vector.extract_strided_slice %53 {offsets = [0, 128], sizes = [8, 64], strides = [1, 1]} : vector<8x256xf32> to vector<8x64xf32>
    %66 = vector.broadcast %19 : vector<1x64xf32> to vector<8x64xf32>
    %67 = arith.addf %65, %66 : vector<8x64xf32>
    %68 = arith.mulf %62, %67 : vector<8x64xf32>
    %69 = arith.addf %64, %68 : vector<8x64xf32>
    %70 = math.tanh %69 : vector<8x64xf32>
    %cst_24 = arith.constant 1.000000e+00 : f32
    %71 = vector.broadcast %cst_24 : f32 to vector<8x64xf32>
    %72 = arith.subf %71, %63 : vector<8x64xf32>
    %73 = arith.mulf %72, %70 : vector<8x64xf32>
    %74 = arith.mulf %63, %46 : vector<8x64xf32>
    %75 = arith.addf %73, %74 : vector<8x64xf32>
    %76 = arith.index_cast %50 : i32 to index
    %c0_25 = arith.constant 0 : index
    %77 = vector.load %arg7[%76, %c0_25] : memref<64x64xf32, #tpu.memory_space<vmem>>, vector<8x64xf32>
    tpu.vector_store %arg7[%76, %c0_25], %75 {strides = array<i32>} : memref<64x64xf32, #tpu.memory_space<vmem>>, vector<8x64xf32>,
    %c2_i32 = arith.constant 2 : i32
    %c8_i32_26 = arith.constant 8 : i32
    %78 = arith.muli %c2_i32, %c8_i32_26 : i32
    %79 = tpu.assume_multiple %78, 8 : i32
    %80 = arith.index_cast %79 : i32 to index
    %c0_27 = arith.constant 0 : index
    %81 = vector.load %arg6[%80, %c0_27] : memref<64x384xf32, #tpu.memory_space<vmem>>, vector<8x384xf32>
    %cst_28 = arith.constant dense<0.000000e+00> : vector<8x256xf32>
    %82 = tpu.matmul %75, %18, %cst_28 {dimension_numbers = #tpu.dot_dimension_numbers<[1], [0], [0], [1], [0, 0, 1, 1], [], []>} : vector<8x64xf32>, vector<64x256xf32>, vector<8x256xf32> -> vector<8x256xf32>
    %83 = vector.extract_strided_slice %81 {offsets = [0, 0], sizes = [8, 128], strides = [1, 1]} : vector<8x384xf32> to vector<8x128xf32>
    %84 = vector.extract_strided_slice %82 {offsets = [0, 0], sizes = [8, 128], strides = [1, 1]} : vector<8x256xf32> to vector<8x128xf32>
    %85 = arith.addf %83, %84 : vector<8x128xf32>
    %86 = arith.negf %85 : vector<8x128xf32>
    %87 = math.exp %86 : vector<8x128xf32>
    %cst_29 = arith.constant 1.000000e+00 : f32
    %88 = vector.broadcast %cst_29 : f32 to vector<8x128xf32>
    %89 = arith.addf %88, %87 : vector<8x128xf32>
    %90 = arith.divf %88, %89 : vector<8x128xf32>
    %91 = vector.extract_strided_slice %90 {offsets = [0, 0], sizes = [8, 64], strides = [1, 1]} : vector<8x128xf32> to vector<8x64xf32>
    %92 = vector.extract_strided_slice %90 {offsets = [0, 64], sizes = [8, 64], strides = [1, 1]} : vector<8x128xf32> to vector<8x64xf32>
    %93 = vector.extract_strided_slice %81 {offsets = [0, 128], sizes = [8, 64], strides = [1, 1]} : vector<8x384xf32> to vector<8x64xf32>
    %94 = vector.extract_strided_slice %82 {offsets = [0, 128], sizes = [8, 64], strides = [1, 1]} : vector<8x256xf32> to vector<8x64xf32>
    %95 = vector.broadcast %19 : vector<1x64xf32> to vector<8x64xf32>
    %96 = arith.addf %94, %95 : vector<8x64xf32>
    %97 = arith.mulf %91, %96 : vector<8x64xf32>
    %98 = arith.addf %93, %97 : vector<8x64xf32>
    %99 = math.tanh %98 : vector<8x64xf32>
    %cst_30 = arith.constant 1.000000e+00 : f32
    %100 = vector.broadcast %cst_30 : f32 to vector<8x64xf32>
    %101 = arith.subf %100, %92 : vector<8x64xf32>
    %102 = arith.mulf %101, %99 : vector<8x64xf32>
    %103 = arith.mulf %92, %75 : vector<8x64xf32>
    %104 = arith.addf %102, %103 : vector<8x64xf32>
    %105 = arith.index_cast %79 : i32 to index
    %c0_31 = arith.constant 0 : index
    %106 = vector.load %arg7[%105, %c0_31] : memref<64x64xf32, #tpu.memory_space<vmem>>, vector<8x64xf32>
    tpu.vector_store %arg7[%105, %c0_31], %104 {strides = array<i32>} : memref<64x64xf32, #tpu.memory_space<vmem>>, vector<8x64xf32>,
    %c3_i32 = arith.constant 3 : i32
    %c8_i32_32 = arith.constant 8 : i32
    %107 = arith.muli %c3_i32, %c8_i32_32 : i32
    %108 = tpu.assume_multiple %107, 8 : i32
    %109 = arith.index_cast %108 : i32 to index
    %c0_33 = arith.constant 0 : index
    %110 = vector.load %arg6[%109, %c0_33] : memref<64x384xf32, #tpu.memory_space<vmem>>, vector<8x384xf32>
    %cst_34 = arith.constant dense<0.000000e+00> : vector<8x256xf32>
    %111 = tpu.matmul %104, %18, %cst_34 {dimension_numbers = #tpu.dot_dimension_numbers<[1], [0], [0], [1], [0, 0, 1, 1], [], []>} : vector<8x64xf32>, vector<64x256xf32>, vector<8x256xf32> -> vector<8x256xf32>
    %112 = vector.extract_strided_slice %110 {offsets = [0, 0], sizes = [8, 128], strides = [1, 1]} : vector<8x384xf32> to vector<8x128xf32>
    %113 = vector.extract_strided_slice %111 {offsets = [0, 0], sizes = [8, 128], strides = [1, 1]} : vector<8x256xf32> to vector<8x128xf32>
    %114 = arith.addf %112, %113 : vector<8x128xf32>
    %115 = arith.negf %114 : vector<8x128xf32>
    %116 = math.exp %115 : vector<8x128xf32>
    %cst_35 = arith.constant 1.000000e+00 : f32
    %117 = vector.broadcast %cst_35 : f32 to vector<8x128xf32>
    %118 = arith.addf %117, %116 : vector<8x128xf32>
    %119 = arith.divf %117, %118 : vector<8x128xf32>
    %120 = vector.extract_strided_slice %119 {offsets = [0, 0], sizes = [8, 64], strides = [1, 1]} : vector<8x128xf32> to vector<8x64xf32>
    %121 = vector.extract_strided_slice %119 {offsets = [0, 64], sizes = [8, 64], strides = [1, 1]} : vector<8x128xf32> to vector<8x64xf32>
    %122 = vector.extract_strided_slice %110 {offsets = [0, 128], sizes = [8, 64], strides = [1, 1]} : vector<8x384xf32> to vector<8x64xf32>
    %123 = vector.extract_strided_slice %111 {offsets = [0, 128], sizes = [8, 64], strides = [1, 1]} : vector<8x256xf32> to vector<8x64xf32>
    %124 = vector.broadcast %19 : vector<1x64xf32> to vector<8x64xf32>
    %125 = arith.addf %123, %124 : vector<8x64xf32>
    %126 = arith.mulf %120, %125 : vector<8x64xf32>
    %127 = arith.addf %122, %126 : vector<8x64xf32>
    %128 = math.tanh %127 : vector<8x64xf32>
    %cst_36 = arith.constant 1.000000e+00 : f32
    %129 = vector.broadcast %cst_36 : f32 to vector<8x64xf32>
    %130 = arith.subf %129, %121 : vector<8x64xf32>
    %131 = arith.mulf %130, %128 : vector<8x64xf32>
    %132 = arith.mulf %121, %104 : vector<8x64xf32>
    %133 = arith.addf %131, %132 : vector<8x64xf32>
    %134 = arith.index_cast %108 : i32 to index
    %c0_37 = arith.constant 0 : index
    %135 = vector.load %arg7[%134, %c0_37] : memref<64x64xf32, #tpu.memory_space<vmem>>, vector<8x64xf32>
    tpu.vector_store %arg7[%134, %c0_37], %133 {strides = array<i32>} : memref<64x64xf32, #tpu.memory_space<vmem>>, vector<8x64xf32>,
    %c4_i32 = arith.constant 4 : i32
    %c8_i32_38 = arith.constant 8 : i32
    %136 = arith.muli %c4_i32, %c8_i32_38 : i32
    %137 = tpu.assume_multiple %136, 8 : i32
    %138 = arith.index_cast %137 : i32 to index
    %c0_39 = arith.constant 0 : index
    %139 = vector.load %arg6[%138, %c0_39] : memref<64x384xf32, #tpu.memory_space<vmem>>, vector<8x384xf32>
    %cst_40 = arith.constant dense<0.000000e+00> : vector<8x256xf32>
    %140 = tpu.matmul %133, %18, %cst_40 {dimension_numbers = #tpu.dot_dimension_numbers<[1], [0], [0], [1], [0, 0, 1, 1], [], []>} : vector<8x64xf32>, vector<64x256xf32>, vector<8x256xf32> -> vector<8x256xf32>
    %141 = vector.extract_strided_slice %139 {offsets = [0, 0], sizes = [8, 128], strides = [1, 1]} : vector<8x384xf32> to vector<8x128xf32>
    %142 = vector.extract_strided_slice %140 {offsets = [0, 0], sizes = [8, 128], strides = [1, 1]} : vector<8x256xf32> to vector<8x128xf32>
    %143 = arith.addf %141, %142 : vector<8x128xf32>
    %144 = arith.negf %143 : vector<8x128xf32>
    %145 = math.exp %144 : vector<8x128xf32>
    %cst_41 = arith.constant 1.000000e+00 : f32
    %146 = vector.broadcast %cst_41 : f32 to vector<8x128xf32>
    %147 = arith.addf %146, %145 : vector<8x128xf32>
    %148 = arith.divf %146, %147 : vector<8x128xf32>
    %149 = vector.extract_strided_slice %148 {offsets = [0, 0], sizes = [8, 64], strides = [1, 1]} : vector<8x128xf32> to vector<8x64xf32>
    %150 = vector.extract_strided_slice %148 {offsets = [0, 64], sizes = [8, 64], strides = [1, 1]} : vector<8x128xf32> to vector<8x64xf32>
    %151 = vector.extract_strided_slice %139 {offsets = [0, 128], sizes = [8, 64], strides = [1, 1]} : vector<8x384xf32> to vector<8x64xf32>
    %152 = vector.extract_strided_slice %140 {offsets = [0, 128], sizes = [8, 64], strides = [1, 1]} : vector<8x256xf32> to vector<8x64xf32>
    %153 = vector.broadcast %19 : vector<1x64xf32> to vector<8x64xf32>
    %154 = arith.addf %152, %153 : vector<8x64xf32>
    %155 = arith.mulf %149, %154 : vector<8x64xf32>
    %156 = arith.addf %151, %155 : vector<8x64xf32>
    %157 = math.tanh %156 : vector<8x64xf32>
    %cst_42 = arith.constant 1.000000e+00 : f32
    %158 = vector.broadcast %cst_42 : f32 to vector<8x64xf32>
    %159 = arith.subf %158, %150 : vector<8x64xf32>
    %160 = arith.mulf %159, %157 : vector<8x64xf32>
    %161 = arith.mulf %150, %133 : vector<8x64xf32>
    %162 = arith.addf %160, %161 : vector<8x64xf32>
    %163 = arith.index_cast %137 : i32 to index
    %c0_43 = arith.constant 0 : index
    %164 = vector.load %arg7[%163, %c0_43] : memref<64x64xf32, #tpu.memory_space<vmem>>, vector<8x64xf32>
    tpu.vector_store %arg7[%163, %c0_43], %162 {strides = array<i32>} : memref<64x64xf32, #tpu.memory_space<vmem>>, vector<8x64xf32>,
    %c5_i32 = arith.constant 5 : i32
    %c8_i32_44 = arith.constant 8 : i32
    %165 = arith.muli %c5_i32, %c8_i32_44 : i32
    %166 = tpu.assume_multiple %165, 8 : i32
    %167 = arith.index_cast %166 : i32 to index
    %c0_45 = arith.constant 0 : index
    %168 = vector.load %arg6[%167, %c0_45] : memref<64x384xf32, #tpu.memory_space<vmem>>, vector<8x384xf32>
    %cst_46 = arith.constant dense<0.000000e+00> : vector<8x256xf32>
    %169 = tpu.matmul %162, %18, %cst_46 {dimension_numbers = #tpu.dot_dimension_numbers<[1], [0], [0], [1], [0, 0, 1, 1], [], []>} : vector<8x64xf32>, vector<64x256xf32>, vector<8x256xf32> -> vector<8x256xf32>
    %170 = vector.extract_strided_slice %168 {offsets = [0, 0], sizes = [8, 128], strides = [1, 1]} : vector<8x384xf32> to vector<8x128xf32>
    %171 = vector.extract_strided_slice %169 {offsets = [0, 0], sizes = [8, 128], strides = [1, 1]} : vector<8x256xf32> to vector<8x128xf32>
    %172 = arith.addf %170, %171 : vector<8x128xf32>
    %173 = arith.negf %172 : vector<8x128xf32>
    %174 = math.exp %173 : vector<8x128xf32>
    %cst_47 = arith.constant 1.000000e+00 : f32
    %175 = vector.broadcast %cst_47 : f32 to vector<8x128xf32>
    %176 = arith.addf %175, %174 : vector<8x128xf32>
    %177 = arith.divf %175, %176 : vector<8x128xf32>
    %178 = vector.extract_strided_slice %177 {offsets = [0, 0], sizes = [8, 64], strides = [1, 1]} : vector<8x128xf32> to vector<8x64xf32>
    %179 = vector.extract_strided_slice %177 {offsets = [0, 64], sizes = [8, 64], strides = [1, 1]} : vector<8x128xf32> to vector<8x64xf32>
    %180 = vector.extract_strided_slice %168 {offsets = [0, 128], sizes = [8, 64], strides = [1, 1]} : vector<8x384xf32> to vector<8x64xf32>
    %181 = vector.extract_strided_slice %169 {offsets = [0, 128], sizes = [8, 64], strides = [1, 1]} : vector<8x256xf32> to vector<8x64xf32>
    %182 = vector.broadcast %19 : vector<1x64xf32> to vector<8x64xf32>
    %183 = arith.addf %181, %182 : vector<8x64xf32>
    %184 = arith.mulf %178, %183 : vector<8x64xf32>
    %185 = arith.addf %180, %184 : vector<8x64xf32>
    %186 = math.tanh %185 : vector<8x64xf32>
    %cst_48 = arith.constant 1.000000e+00 : f32
    %187 = vector.broadcast %cst_48 : f32 to vector<8x64xf32>
    %188 = arith.subf %187, %179 : vector<8x64xf32>
    %189 = arith.mulf %188, %186 : vector<8x64xf32>
    %190 = arith.mulf %179, %162 : vector<8x64xf32>
    %191 = arith.addf %189, %190 : vector<8x64xf32>
    %192 = arith.index_cast %166 : i32 to index
    %c0_49 = arith.constant 0 : index
    %193 = vector.load %arg7[%192, %c0_49] : memref<64x64xf32, #tpu.memory_space<vmem>>, vector<8x64xf32>
    tpu.vector_store %arg7[%192, %c0_49], %191 {strides = array<i32>} : memref<64x64xf32, #tpu.memory_space<vmem>>, vector<8x64xf32>,
    %c6_i32 = arith.constant 6 : i32
    %c8_i32_50 = arith.constant 8 : i32
    %194 = arith.muli %c6_i32, %c8_i32_50 : i32
    %195 = tpu.assume_multiple %194, 8 : i32
    %196 = arith.index_cast %195 : i32 to index
    %c0_51 = arith.constant 0 : index
    %197 = vector.load %arg6[%196, %c0_51] : memref<64x384xf32, #tpu.memory_space<vmem>>, vector<8x384xf32>
    %cst_52 = arith.constant dense<0.000000e+00> : vector<8x256xf32>
    %198 = tpu.matmul %191, %18, %cst_52 {dimension_numbers = #tpu.dot_dimension_numbers<[1], [0], [0], [1], [0, 0, 1, 1], [], []>} : vector<8x64xf32>, vector<64x256xf32>, vector<8x256xf32> -> vector<8x256xf32>
    %199 = vector.extract_strided_slice %197 {offsets = [0, 0], sizes = [8, 128], strides = [1, 1]} : vector<8x384xf32> to vector<8x128xf32>
    %200 = vector.extract_strided_slice %198 {offsets = [0, 0], sizes = [8, 128], strides = [1, 1]} : vector<8x256xf32> to vector<8x128xf32>
    %201 = arith.addf %199, %200 : vector<8x128xf32>
    %202 = arith.negf %201 : vector<8x128xf32>
    %203 = math.exp %202 : vector<8x128xf32>
    %cst_53 = arith.constant 1.000000e+00 : f32
    %204 = vector.broadcast %cst_53 : f32 to vector<8x128xf32>
    %205 = arith.addf %204, %203 : vector<8x128xf32>
    %206 = arith.divf %204, %205 : vector<8x128xf32>
    %207 = vector.extract_strided_slice %206 {offsets = [0, 0], sizes = [8, 64], strides = [1, 1]} : vector<8x128xf32> to vector<8x64xf32>
    %208 = vector.extract_strided_slice %206 {offsets = [0, 64], sizes = [8, 64], strides = [1, 1]} : vector<8x128xf32> to vector<8x64xf32>
    %209 = vector.extract_strided_slice %197 {offsets = [0, 128], sizes = [8, 64], strides = [1, 1]} : vector<8x384xf32> to vector<8x64xf32>
    %210 = vector.extract_strided_slice %198 {offsets = [0, 128], sizes = [8, 64], strides = [1, 1]} : vector<8x256xf32> to vector<8x64xf32>
    %211 = vector.broadcast %19 : vector<1x64xf32> to vector<8x64xf32>
    %212 = arith.addf %210, %211 : vector<8x64xf32>
    %213 = arith.mulf %207, %212 : vector<8x64xf32>
    %214 = arith.addf %209, %213 : vector<8x64xf32>
    %215 = math.tanh %214 : vector<8x64xf32>
    %cst_54 = arith.constant 1.000000e+00 : f32
    %216 = vector.broadcast %cst_54 : f32 to vector<8x64xf32>
    %217 = arith.subf %216, %208 : vector<8x64xf32>
    %218 = arith.mulf %217, %215 : vector<8x64xf32>
    %219 = arith.mulf %208, %191 : vector<8x64xf32>
    %220 = arith.addf %218, %219 : vector<8x64xf32>
    %221 = arith.index_cast %195 : i32 to index
    %c0_55 = arith.constant 0 : index
    %222 = vector.load %arg7[%221, %c0_55] : memref<64x64xf32, #tpu.memory_space<vmem>>, vector<8x64xf32>
    tpu.vector_store %arg7[%221, %c0_55], %220 {strides = array<i32>} : memref<64x64xf32, #tpu.memory_space<vmem>>, vector<8x64xf32>,
    %c7_i32 = arith.constant 7 : i32
    %c8_i32_56 = arith.constant 8 : i32
    %223 = arith.muli %c7_i32, %c8_i32_56 : i32
    %224 = tpu.assume_multiple %223, 8 : i32
    %225 = arith.index_cast %224 : i32 to index
    %c0_57 = arith.constant 0 : index
    %226 = vector.load %arg6[%225, %c0_57] : memref<64x384xf32, #tpu.memory_space<vmem>>, vector<8x384xf32>
    %cst_58 = arith.constant dense<0.000000e+00> : vector<8x256xf32>
    %227 = tpu.matmul %220, %18, %cst_58 {dimension_numbers = #tpu.dot_dimension_numbers<[1], [0], [0], [1], [0, 0, 1, 1], [], []>} : vector<8x64xf32>, vector<64x256xf32>, vector<8x256xf32> -> vector<8x256xf32>
    %228 = vector.extract_strided_slice %226 {offsets = [0, 0], sizes = [8, 128], strides = [1, 1]} : vector<8x384xf32> to vector<8x128xf32>
    %229 = vector.extract_strided_slice %227 {offsets = [0, 0], sizes = [8, 128], strides = [1, 1]} : vector<8x256xf32> to vector<8x128xf32>
    %230 = arith.addf %228, %229 : vector<8x128xf32>
    %231 = arith.negf %230 : vector<8x128xf32>
    %232 = math.exp %231 : vector<8x128xf32>
    %cst_59 = arith.constant 1.000000e+00 : f32
    %233 = vector.broadcast %cst_59 : f32 to vector<8x128xf32>
    %234 = arith.addf %233, %232 : vector<8x128xf32>
    %235 = arith.divf %233, %234 : vector<8x128xf32>
    %236 = vector.extract_strided_slice %235 {offsets = [0, 0], sizes = [8, 64], strides = [1, 1]} : vector<8x128xf32> to vector<8x64xf32>
    %237 = vector.extract_strided_slice %235 {offsets = [0, 64], sizes = [8, 64], strides = [1, 1]} : vector<8x128xf32> to vector<8x64xf32>
    %238 = vector.extract_strided_slice %226 {offsets = [0, 128], sizes = [8, 64], strides = [1, 1]} : vector<8x384xf32> to vector<8x64xf32>
    %239 = vector.extract_strided_slice %227 {offsets = [0, 128], sizes = [8, 64], strides = [1, 1]} : vector<8x256xf32> to vector<8x64xf32>
    %240 = vector.broadcast %19 : vector<1x64xf32> to vector<8x64xf32>
    %241 = arith.addf %239, %240 : vector<8x64xf32>
    %242 = arith.mulf %236, %241 : vector<8x64xf32>
    %243 = arith.addf %238, %242 : vector<8x64xf32>
    %244 = math.tanh %243 : vector<8x64xf32>
    %cst_60 = arith.constant 1.000000e+00 : f32
    %245 = vector.broadcast %cst_60 : f32 to vector<8x64xf32>
    %246 = arith.subf %245, %237 : vector<8x64xf32>
    %247 = arith.mulf %246, %244 : vector<8x64xf32>
    %248 = arith.mulf %237, %220 : vector<8x64xf32>
    %249 = arith.addf %247, %248 : vector<8x64xf32>
    %250 = arith.index_cast %224 : i32 to index
    %c0_61 = arith.constant 0 : index
    %251 = vector.load %arg7[%250, %c0_61] : memref<64x64xf32, #tpu.memory_space<vmem>>, vector<8x64xf32>
    tpu.vector_store %arg7[%250, %c0_61], %249 {strides = array<i32>} : memref<64x64xf32, #tpu.memory_space<vmem>>, vector<8x64xf32>,
    %c8_i32_62 = arith.constant 8 : i32
    %c0_63 = arith.constant 0 : index
    %c0_64 = arith.constant 0 : index
    %252 = vector.load %arg7[%c0_63, %c0_64] : memref<64x64xf32, #tpu.memory_space<vmem>>, vector<64x64xf32>
    %c0_65 = arith.constant 0 : index
    %c512 = arith.constant 512 : index
    %253 = vector.load %arg3[%c0_65, %c512] : memref<64x768xf32, #tpu.memory_space<vmem>>, vector<64x128xf32>
    %cst_66 = arith.constant dense<0.000000e+00> : vector<64x128xf32>
    %254 = tpu.matmul %252, %253, %cst_66 {dimension_numbers = #tpu.dot_dimension_numbers<[1], [0], [0], [1], [0, 0, 1, 1], [], []>} : vector<64x64xf32>, vector<64x128xf32>, vector<64x128xf32> -> vector<64x128xf32>
    %c0_67 = arith.constant 0 : index
    %c256_68 = arith.constant 256 : index
    %255 = vector.load %arg6[%c0_67, %c256_68] : memref<64x384xf32, #tpu.memory_space<vmem>>, vector<64x128xf32>
    %256 = tpu.concatenate %15, %15, %15, %15, %15, %15, %15, %15 in 0 : vector<8x128xf32>, vector<8x128xf32>, vector<8x128xf32>, vector<8x128xf32>, vector<8x128xf32>, vector<8x128xf32>, vector<8x128xf32>, vector<8x128xf32> -> vector<64x128xf32>
    %257 = arith.addf %254, %256 : vector<64x128xf32>
    %258 = arith.addf %257, %255 : vector<64x128xf32>
    %259 = vector.extract_strided_slice %258 {offsets = [0, 0], sizes = [64, 64], strides = [1, 1]} : vector<64x128xf32> to vector<64x64xf32>
    %260 = vector.extract_strided_slice %258 {offsets = [0, 64], sizes = [64, 64], strides = [1, 1]} : vector<64x128xf32> to vector<64x64xf32>
    %261 = arith.maximumf %259, %260 : vector<64x64xf32>
    %c0_69 = arith.constant 0 : index
    %c640 = arith.constant 640 : index
    %262 = vector.load %arg3[%c0_69, %c640] : memref<64x768xf32, #tpu.memory_space<vmem>>, vector<64x128xf32>
    %cst_70 = arith.constant dense<0.000000e+00> : vector<64x128xf32>
    %263 = tpu.matmul %261, %262, %cst_70 {dimension_numbers = #tpu.dot_dimension_numbers<[1], [0], [0], [1], [0, 0, 1, 1], [], []>} : vector<64x64xf32>, vector<64x128xf32>, vector<64x128xf32> -> vector<64x128xf32>
    %c0_71 = arith.constant 0 : index
    %c0_72 = arith.constant 0 : index
    %264 = vector.load %arg5[%c0_71, %c0_72] : memref<64x128xf32, #tpu.memory_space<vmem>>, vector<64x128xf32>
    tpu.vector_store %arg5[%c0_71, %c0_72], %263 {strides = array<i32>} : memref<64x128xf32, #tpu.memory_space<vmem>>, vector<64x128xf32>,
    return
  }
}

</mosaic_0001>

<bundles_post_ra>
// kernel: decoder_forward.1
= control target key start
LH: loop header
LB: loop body
LE: loop exit
PB: predicated region body
PF: predicated region fallthrough
CT: control target
= control target key end

     0   :  { %10 = vsyncpa [#allocation5], 0  ;;  %s2680_s0 = inlined_call_operand.vmem [shape: s32[64,1], index: 0, kind: input, shape index: {}]   ;;  %s2681_s1 = inlined_call_operand.vmem [shape: f32[8,64], index: 1, kind: input, shape index: {}]   ;;  %s2682_s2 = inlined_call_operand.hbm [shape: f32[128,384], index: 2, kind: input, shape index: {}]   ;;  %s2683_s3 = inlined_call_operand.hbm [shape: f32[64,768], index: 3, kind: input, shape index: {}]   ;;  %s2684_s4 = inlined_call_operand.vmem [shape: f32[1,384], index: 4, kind: input, shape index: {}]   ;;  %s2685_s5 = inlined_call_operand.vmem [shape: f32[64,128], index: 5, kind: output, shape index: {}]  }
   0x1   :  { %11 = vsyncpa [#allocation7], 0  ;;  %s2290_s18 = smov [#allocation4]   ;;  %s2242_s22 = scalar_lea.hbm %s2682_s2, 6144 }
   0x2   :  { %s21_s19 = sshll.u32 %s2290_s18, 4  ;;  %p2243_p0 = scmp.ne.s32.totalorder %s2682_s2, %s2242_s22  ;;  %s22_s19 = int_to_ptr.vmem [resolvable:$true] %s21_s19 }
   0x3   :  { %p2246_p1 = scmp.lt.u32.totalorder %s2242_s22, %s2682_s2 }
   0x5   :  { %p2248_p2 = pnand %p2246_p1, %p2243_p0 }
   0x7   :  { %2251 = shalt.err (!%p2248_p2)
}
   0x8   :  { %s2252_s27 = scalar_lea.vmem %s22_s19, 6144  ;;  %p2257_p4 = scmp.lt.s32.totalorder %s22_s19, %s22_s19 }
   0x9   :  { %p2253_p3 = scmp.ne.s32.totalorder %s22_s19, %s2252_s27  ;;  %p2258_p5 = scmp.lt.s32.totalorder %s2252_s27, %s2252_s27 }
   0xb   :  { %p2259_p6 = por %p2258_p5, %p2257_p4 }
   0xd   :  { %p2260_p7 = pnand %p2259_p6, %p2253_p3 }
   0xf   :  { %2263 = shalt.err (!%p2260_p7)
}
  0x10   :  { %s2291_s28 = smov 384   ;;  %s2292_s29 = smov 24  }
  0x11   :  { %27 = dma.hbm_to_vmem [thread:$0]  %s2682_s2, 6144, %s22_s19, [#allocation5], %s2291_s28, %s2291_s28, %s2292_s29  }
  0x12   :  { %s2293_s7 = smov [#allocation6]   ;;  %s2264_s11 = scalar_lea.hbm %s2683_s3, 6144 }
  0x13   :  { %s33_s8 = sshll.u32 %s2293_s7, 4  ;;  %p2265_p8 = scmp.ne.s32.totalorder %s2683_s3, %s2264_s11  ;;  %s34_s8 = int_to_ptr.vmem [resolvable:$true] %s33_s8 }
  0x14   :  { %p2268_p9 = scmp.lt.u32.totalorder %s2264_s11, %s2683_s3 }
  0x16   :  { %p2270_p10 = pnand %p2268_p9, %p2265_p8 }
  0x18   :  { %2273 = shalt.err (!%p2270_p10)
}
  0x19   :  { %s2274_s16 = scalar_lea.vmem %s34_s8, 6144  ;;  %p2279_p12 = scmp.lt.s32.totalorder %s34_s8, %s34_s8 }
  0x1a   :  { %p2275_p11 = scmp.ne.s32.totalorder %s34_s8, %s2274_s16  ;;  %p2280_p13 = scmp.lt.s32.totalorder %s2274_s16, %s2274_s16 }
  0x1c   :  { %p2281_p0 = por %p2280_p13, %p2279_p12 }
  0x1e   :  { %p2282_p1 = pnand %p2281_p0, %p2275_p11 }
  0x20   :  { %2285 = shalt.err (!%p2282_p1)
}
  0x21   :  { %s2294_s2 = smov 768   ;;  %s2295_s17 = smov 48  }
  0x22   :  { %39 = dma.hbm_to_vmem [thread:$0]  %s2683_s3, 6144, %s34_s8, [#allocation7], %s2294_s2, %s2294_s2, %s2295_s17  }
  0x23   :  { %2286 = dma.done.wait [#allocation5], 6144  }
  0x24   :  { %2287 = vsyncadd [#allocation5], 4294961152 }
  0x25   :  { %2288 = dma.done.wait [#allocation7], 6144  }
  0x26   :  { %2289 = vsyncadd [#allocation7], 4294961152  ;;  %v2296_v0 = vmov 0   ;;  %v50_v1 = vld [vmem:[%s2680_s0 + $0x10] sm:$0xff]  ;;  %v48_v2 = vld [vmem:[%s2680_s0] sm:$0xff]  ;;  %v2297_v6 = vmov 0.0  }
  0x27   :  { %2191 = vset.pattern.permute.xlu1 %v2296_v0  ;;  %2190 = vset.pattern.permute.xlu0 %v2296_v0  ;;  %v51_v3 = vld [vmem:[%s2680_s0 + $0x18] sm:$0xff]  ;;  %v49_v4 = vld [vmem:[%s2680_s0 + $0x8] sm:$0xff]  ;;  %v110_v7 = vld [vmem:[#allocation4 + $0x20] sm:$0xff]  ;;  %vm425_vm8 = vcmask 523264   ;;  %s2299_s12 = smov 64  }
  0x28   :  { %65 = vperm.xlu1 %2191, %v50_v1   ;;  %59 = vperm.xlu0 %2190, %v48_v2   ;;  %v107_v5 = vld [vmem:[#allocation4 + $0x8] sm:$0xff]  ;;  %v106_v8 = vld [vmem:[#allocation4] sm:$0xff]  ;;  %v109_v9 = vld [vmem:[#allocation4 + $0x18] sm:$0xff] }
  0x29   :  { %218 = vmatprep.mubr.f32.mxu0 %v2297_v6  ;;  %v53_v10 = vld [vmem:[%s2680_s0 + $0x28] sm:$0xff]  ;;  %v52_v11 = vld [vmem:[%s2680_s0 + $0x20] sm:$0xff]  ;;  %v1924_v12 = vpack.c.bf16 %v110_v7, %v107_v5  ;;  %v1926_v13 = vpack.c.bf16 %v109_v9, %v106_v8  ;;  %v108_v14 = vld [vmem:[#allocation4 + $0x10] sm:$0xff] }
  0x2a   :  { %v111_v15 = vld [vmem:[#allocation4 + $0x28] sm:$0xff]  ;;  %v113_v16 = vld [vmem:[#allocation4 + $0x38] sm:$0xff]  ;;  %v116_v18 = vld [vmem:[#allocation4 + $0x50] sm:$0xff] }
  0x2b   :  { %v1956_v17 = vpack.c.bf16 %v111_v15, %v108_v14  ;;  %v112_v19 = vld [vmem:[#allocation4 + $0x30] sm:$0xff]  ;;  %v115_v20 = vld [vmem:[#allocation4 + $0x48] sm:$0xff]  ;;  %1925 = vmatprep.subr.bf16.mxu0 %v1924_v12  ;;  %v1928_v21 = vpack.c.bf16 %v116_v18, %v113_v16  ;;  %v114_v22 = vld [vmem:[#allocation4 + $0x40] sm:$0xff] }
  0x2c   :  { %68 = vperm.xlu1 %2191, %v51_v3   ;;  %62 = vperm.xlu0 %2190, %v49_v4   ;;  %v117_v23 = vld [vmem:[#allocation4 + $0x58] sm:$0xff]  ;;  %v119_v24 = vld [vmem:[#allocation4 + $0x68] sm:$0xff]  ;;  %v1930_v25 = vpack.c.bf16 %v115_v20, %v112_v19  ;;  %v122_v27 = vld [vmem:[#allocation4 + $0x80] sm:$0xff] }
  0x2d   :  { %1927 = vmatpush1.bf16.msra.mxu0 %v1926_v13  ;;  %1957 = vmatprep.subr.bf16.mxu1 %v1956_v17  ;;  %v1960_v26 = vpack.c.bf16 %v117_v23, %v114_v22  ;;  %v118_v28 = vld [vmem:[#allocation4 + $0x60] sm:$0xff]  ;;  %v1932_v29 = vpack.c.bf16 %v122_v27, %v119_v24  ;;  %v121_v30 = vld [vmem:[#allocation4 + $0x78] sm:$0xff]  ;;  %v120_v31 = vld [vmem:[#allocation4 + $0x70] sm:$0xff]  ;;  %v56_v22 = vlaneseq }
  0x2e   :  { %1929 = vmatprep.subr.bf16.mxu0 %v1928_v21  ;;  %1959 = vmatpush3.bf16.msra.mxu1 %v1956_v17  ;;  %v123_v32 = vld [vmem:[#allocation4 + $0x88] sm:$0xff]  ;;  %v55_v33 = vld [vmem:[%s2680_s0 + $0x38] sm:$0xff]  ;;  %v128_v35 = vld [vmem:[#allocation4 + $0xb0] sm:$0xff]  ;;  %v1934_v40 = vpack.c.bf16 %v121_v30, %v118_v28  ;;  %v2298_v30 = vmov 1.0  }
  0x2f   :  { %v125_v34 = vld [vmem:[#allocation4 + $0x98] sm:$0xff]  ;;  %v54_v36 = vld [vmem:[%s2680_s0 + $0x30] sm:$0xff]  ;;  %1961 = vmatprep.subr.bf16.mxu1 %v1960_v26  ;;  %v1964_v37 = vpack.c.bf16 %v123_v32, %v120_v31  ;;  %v126_v38 = vld [vmem:[#allocation4 + $0xa0] sm:$0xff]  ;;  %v2380_v23 = vand.u32 127, %v56_v22 }
  0x30   :  { %74 = vperm.xlu1 %2191, %v53_v10   ;;  %71 = vperm.xlu0 %2190, %v52_v11   ;;  %v129_v39 = vld [vmem:[#allocation4 + $0xb8] sm:$0xff]  ;;  %v1936_v41 = vpack.c.bf16 %v128_v35, %v125_v34  ;;  %v124_v42 = vld [vmem:[#allocation4 + $0x90] sm:$0xff]  ;;  %v127_v43 = vld [vmem:[#allocation4 + $0xa8] sm:$0xff] }
  0x31   :  { %1931 = vmatpush1.bf16.msra.mxu0 %v1930_v25  ;;  %v1968_v44 = vpack.c.bf16 %v129_v39, %v126_v38  ;;  %v131_v45 = vld [vmem:[#allocation4 + $0xc8] sm:$0xff]  ;;  %v134_v46 = vld [vmem:[#allocation4 + $0xe0] sm:$0xff]  ;;  %v132_v47 = vld [vmem:[#allocation4 + $0xd0] sm:$0xff]  ;;  %v1938_v49 = vpack.c.bf16 %v127_v43, %v124_v42 }
  0x32   :  { %1933 = vmatprep.subr.bf16.mxu0 %v1932_v29  ;;  %1963 = vmatpush3.bf16.msra.mxu1 %v1960_v26  ;;  %v135_v48 = vld [vmem:[#allocation4 + $0xe8] sm:$0xff]  ;;  %v1940_v50 = vpack.c.bf16 %v134_v46, %v131_v45  ;;  %v130_v51 = vld [vmem:[#allocation4 + $0xc0] sm:$0xff]  ;;  %v133_v52 = vld [vmem:[#allocation4 + $0xd8] sm:$0xff] }
  0x33   :  { %1965 = vmatprep.subr.bf16.mxu1 %v1964_v37  ;;  %v1972_v53 = vpack.c.bf16 %v135_v48, %v132_v47  ;;  %v137_v54 = vld [vmem:[#allocation4 + $0xf8] sm:$0xff]  ;;  %v140_v55 = vld [vmem:[#allocation4 + $0x110] sm:$0xff]  ;;  %v138_v56 = vld [vmem:[#allocation4 + $0x100] sm:$0xff]  ;;  %v1942_v58 = vpack.c.bf16 %v133_v52, %v130_v51 }
  0x34   :  { %80 = vperm.xlu1 %2191, %v55_v33   ;;  %77 = vperm.xlu0 %2190, %v54_v36   ;;  %v141_v57 = vld [vmem:[#allocation4 + $0x118] sm:$0xff]  ;;  %v1944_v59 = vpack.c.bf16 %v140_v55, %v137_v54  ;;  %v136_v60 = vld [vmem:[#allocation4 + $0xf0] sm:$0xff]  ;;  %v139_v61 = vld [vmem:[#allocation4 + $0x108] sm:$0xff] }
  0x35   :  { %1935 = vmatpush1.bf16.msra.mxu0 %v1934_v40  ;;  %v1976_v62 = vpack.c.bf16 %v141_v57, %v138_v56  ;;  %v143_v63 = vld [vmem:[#allocation4 + $0x128] sm:$0xff]  ;;  %v146_v0 = vld [vmem:[#allocation4 + $0x140] sm:$0xff]  ;;  %v144_v1 = vld [vmem:[#allocation4 + $0x130] sm:$0xff]  ;;  %v1946_v3 = vpack.c.bf16 %v139_v61, %v136_v60 }
  0x36   :  { %1937 = vmatprep.subr.bf16.mxu0 %v1936_v41  ;;  %1967 = vmatpush3.bf16.msra.mxu1 %v1964_v37  ;;  %v147_v2 = vld [vmem:[#allocation4 + $0x148] sm:$0xff]  ;;  %v1948_v4 = vpack.c.bf16 %v146_v0, %v143_v63  ;;  %v142_v5 = vld [vmem:[#allocation4 + $0x120] sm:$0xff]  ;;  %v145_v7 = vld [vmem:[#allocation4 + $0x138] sm:$0xff] }
  0x37   :  { %1969 = vmatprep.subr.bf16.mxu1 %v1968_v44  ;;  %v1980_v8 = vpack.c.bf16 %v147_v2, %v144_v1  ;;  %v149_v9 = vld [vmem:[#allocation4 + $0x158] sm:$0xff]  ;;  %v152_v10 = vld [vmem:[#allocation4 + $0x170] sm:$0xff]  ;;  %v150_v11 = vld [vmem:[#allocation4 + $0x160] sm:$0xff]  ;;  %v1950_v13 = vpack.c.bf16 %v145_v7, %v142_v5 }
  0x38   :  { %v153_v12 = vld [vmem:[#allocation4 + $0x178] sm:$0xff]  ;;  %v1952_v14 = vpack.c.bf16 %v152_v10, %v149_v9  ;;  %v148_v15 = vld [vmem:[#allocation4 + $0x150] sm:$0xff]  ;;  %v151_v16 = vld [vmem:[#allocation4 + $0x168] sm:$0xff] }
  0x39   :  { %1939 = vmatpush1.bf16.msra.mxu0 %v1938_v49  ;;  %v1984_v17 = vpack.c.bf16 %v153_v12, %v150_v11  ;;  %v398_v18 = vld [vmem:[#allocation6 + $0x8] sm:$0xff]  ;;  %v400_v19 = vld [vmem:[#allocation6 + $0x38] sm:$0xff]  ;;  %v1954_v20 = vpack.c.bf16 %v151_v16, %v148_v15  ;;  %v397_v26 = vld [vmem:[#allocation6] sm:$0xff] }
  0x3a   :  { %1941 = vmatprep.subr.bf16.mxu0 %v1940_v50  ;;  %1971 = vmatpush3.bf16.msra.mxu1 %v1968_v44  ;;  %v1988_v21 = vpack.c.bf16 %v400_v19, %v398_v18  ;;  %v399_v27 = vld [vmem:[#allocation6 + $0x30] sm:$0xff]  ;;  %v402_v28 = vld [vmem:[#allocation6 + $0x68] sm:$0xff]  ;;  %v404_v29 = vld [vmem:[#allocation6 + $0x98] sm:$0xff] }
  0x3b   :  { %1973 = vmatprep.subr.bf16.mxu1 %v1972_v53  ;;  %v1990_v31 = vpack.c.bf16 %v399_v27, %v397_v26  ;;  %v1992_v34 = vpack.c.bf16 %v404_v29, %v402_v28  ;;  %v401_v35 = vld [vmem:[#allocation6 + $0x60] sm:$0xff]  ;;  %v403_v36 = vld [vmem:[#allocation6 + $0x90] sm:$0xff]  ;;  %v406_v37 = vld [vmem:[#allocation6 + $0xc8] sm:$0xff] }
  0x3c   :  { %v408_v38 = vld [vmem:[#allocation6 + $0xf8] sm:$0xff]  ;;  %v1994_v39 = vpack.c.bf16 %v403_v36, %v401_v35  ;;  %v405_v43 = vld [vmem:[#allocation6 + $0xc0] sm:$0xff]  ;;  %v407_v44 = vld [vmem:[#allocation6 + $0xf0] sm:$0xff] }
  0x3d   :  { %1943 = vmatpush1.bf16.msra.mxu0 %v1942_v58  ;;  %v1996_v42 = vpack.c.bf16 %v408_v38, %v406_v37  ;;  %v410_v45 = vld [vmem:[#allocation6 + $0x128] sm:$0xff]  ;;  %v412_v46 = vld [vmem:[#allocation6 + $0x158] sm:$0xff]  ;;  %v1998_v47 = vpack.c.bf16 %v407_v44, %v405_v43  ;;  %v409_v50 = vld [vmem:[#allocation6 + $0x120] sm:$0xff] }
  0x3e   :  { %1945 = vmatprep.subr.bf16.mxu0 %v1944_v59  ;;  %1975 = vmatpush3.bf16.msra.mxu1 %v1972_v53  ;;  %v2000_v49 = vpack.c.bf16 %v412_v46, %v410_v45  ;;  %v411_v51 = vld [vmem:[#allocation6 + $0x150] sm:$0xff]  ;;  %v396_v54 = vld [vmem:[%s2681_s1] sm:$0xff]  ;;  %v502_v55 = vld [vmem:[#allocation6 + $0x18] sm:$0xff] }
  0x3f   :  { %1977 = vmatprep.subr.bf16.mxu1 %v1976_v62  ;;  %v2002_v53 = vpack.c.bf16 %v411_v51, %v409_v50  ;;  %v504_v56 = vld [vmem:[#allocation6 + $0x48] sm:$0xff]  ;;  %v501_v57 = vld [vmem:[#allocation6 + $0x10] sm:$0xff]  ;;  %v503_v59 = vld [vmem:[#allocation6 + $0x40] sm:$0xff] }
  0x40   :  { %v2440_v58 = vpack.c.bf16 %v504_v56, %v502_v55  ;;  %v2442_v60 = vpack.c.bf16 %v503_v59, %v501_v57  ;;  %v506_v61 = vld [vmem:[#allocation6 + $0x78] sm:$0xff]  ;;  %v505_v63 = vld [vmem:[#allocation6 + $0x70] sm:$0xff]  ;;  %v507_v1 = vld [vmem:[#allocation6 + $0xa0] sm:$0xff] }
  0x41   :  { %1947 = vmatpush1.bf16.msra.mxu0 %v1946_v3  ;;  %v2450_v2 = vpack.c.bf16 %v507_v1, %v505_v63  ;;  %v416_v3 = vshrl.u32 %v56_v22, 7  ;;  %v512_v5 = vld [vmem:[#allocation6 + $0x108] sm:$0xff]  ;;  %v509_v7 = vld [vmem:[#allocation6 + $0xd0] sm:$0xff]  ;;  %v511_v10 = vld [vmem:[#allocation6 + $0x100] sm:$0xff] }
  0x42   :  { %1949 = vmatprep.subr.bf16.mxu0 %v1948_v4  ;;  %1979 = vmatpush3.bf16.msra.mxu1 %v1976_v62  ;;  %v508_v62 = vld [vmem:[#allocation6 + $0xa8] sm:$0xff]  ;;  %v510_v4 = vld [vmem:[#allocation6 + $0xd8] sm:$0xff]  ;;  %v413_v11 = vld [vmem:[%s2684_s4] sm:$0x3]  ;;  %v2462_v12 = vpack.c.bf16 %v511_v10, %v509_v7 }
  0x43   :  { %1981 = vmatprep.subr.bf16.mxu1 %v1980_v8  ;;  %v2448_v0 = vpack.c.bf16 %v508_v62, %v506_v61  ;;  %v2457_v9 = vpack.c.bf16 %v512_v5, %v510_v4  ;;  %v516_v15 = vld [vmem:[#allocation6 + $0x168] sm:$0xff]  ;;  %v513_v16 = vld [vmem:[#allocation6 + $0x130] sm:$0xff]  ;;  %v515_v18 = vld [vmem:[#allocation6 + $0x160] sm:$0xff]  ;;  %v421_v28 = vsub.s32 1, %v416_v3 }
  0x44   :  { %v2470_v19 = vpack.c.bf16 %v515_v18, %v513_v16 }
  0x45   :  { %1951 = vmatpush1.bf16.msra.mxu0 %v1950_v13 }
  0x46   :  { %1953 = vmatprep.subr.bf16.mxu0 %v1952_v14  ;;  %1983 = vmatpush3.bf16.msra.mxu1 %v1980_v8  ;;  %v417_v8 = vsub.s32 0, %v416_v3  ;;  %v514_v14 = vld [vmem:[#allocation6 + $0x138] sm:$0xff] }
  0x47   :  { %1985 = vmatprep.subr.bf16.mxu1 %v1984_v17 }
  0x48   :  { %v418_v13 = vrot.slane %v413_v11, %v417_v8 }
  0x49   :  { %1955 = vmatpush1.bf16.msra.mxu0 %v1954_v20 }
  0x4a   :  { %1987 = vmatpush3.bf16.msra.mxu1 %v1984_v17  ;;  %2005 = vmatprep.subr.bf16.mxu0 %v2440_v58  ;;  %v2468_v17 = vpack.c.bf16 %v516_v15, %v514_v14 }
  0x4b   :  { %1989 = vmatprep.subr.bf16.mxu1 %v1988_v21 }
  0xa7   :  { %v66_v24 = vpop.permute.xlu1 %65  ;;  %v60_v25 = vpop.permute.xlu0 %59 }
  0xa8   :  { %vm82_vm0 = vcmp.eq.s32.totalorder %v60_v25, %v2380_v23  ;;  %vm84_vm1 = vcmp.eq.s32.totalorder %v66_v24, %v2380_v23 }
  0xa9   :  { %1718 = vmatmul.mubr.msk.f32.vlgmr.msra.gmra.mrb[0].mxu0 %vm82_vm0, %v2298_v30  ;;  %1856 = vmatprep.mubr.msk.f32.mxu1 %vm82_vm0, %v2298_v30 }
  0xaa   :  { %224 = vmatprep.mubr.f32.mxu0 %v2297_v6  ;;  %2007 = vmatpush1.bf16.msra.mxu0 %v2442_v60 }
  0xab   :  { %v69_v32 = vpop.permute.xlu1 %68  ;;  %v63_v33 = vpop.permute.xlu0 %62  ;;  %2009 = vmatprep.subr.bf16.mxu0 %v2448_v0 }
  0xac   :  { %vm83_vm2 = vcmp.eq.s32.totalorder %v63_v33, %v2380_v23  ;;  %vm85_vm3 = vcmp.eq.s32.totalorder %v69_v32, %v2380_v23 }
  0xad   :  { %1719 = vmatmul.mubr.msk.f32.gmra.mrb[2].mxu0 %vm83_vm2, %v2298_v30  ;;  %1857 = vmatmul.mubr.msk.f32.vlgmr.msra.gmra.mrb[0].mxu1 %vm83_vm2, %v2298_v30 }
  0xae   :  { %1991 = vmatpush1.bf16.msra.mxu1 %v1990_v31  ;;  %1859 = vmatprep.mubr.msk.f32.mxu1 %vm84_vm1, %v2298_v30  ;;  %v422_v31 = vrot.slane %v413_v11, %v421_v28 }
  0xaf   :  { %v75_v40 = vpop.permute.xlu1 %74  ;;  %v72_v41 = vpop.permute.xlu0 %71  ;;  %230 = vmatprep.mubr.f32.mxu0 %v2297_v6  ;;  %1993 = vmatprep.subr.bf16.mxu1 %v1992_v34 }
  0xb0   :  { %vm86_vm4 = vcmp.eq.s32.totalorder %v72_v41, %v2380_v23  ;;  %vm87_vm5 = vcmp.eq.s32.totalorder %v75_v40, %v2380_v23  ;;  %2011 = vmatpush1.bf16.msra.mxu0 %v2450_v2 }
  0xb1   :  { %1720 = vmatmul.mubr.msk.f32.gmra.mrb[4].mxu0 %vm84_vm1, %v2298_v30  ;;  %1860 = vmatmul.mubr.msk.f32.gmra.mrb[2].mxu1 %vm85_vm3, %v2298_v30 }
  0xb2   :  { %1995 = vmatpush1.bf16.msra.mxu1 %v1994_v39  ;;  %1862 = vmatprep.mubr.msk.f32.mxu1 %vm86_vm4, %v2298_v30 }
  0xb3   :  { %v78_v48 = vpop.permute.xlu0 %77  ;;  %236 = vmatprep.mubr.f32.mxu0 %v2297_v6  ;;  %1997 = vmatprep.subr.bf16.mxu1 %v1996_v42  ;;  %v81_v52 = vpop.permute.xlu1 %80 }
  0xb4   :  { %vm88_vm6 = vcmp.eq.s32.totalorder %v78_v48, %v2380_v23  ;;  %vm89_vm7 = vcmp.eq.s32.totalorder %v81_v52, %v2380_v23  ;;  %2013 = vmatprep.subr.bf16.mxu0 %v2457_v9 }
  0xb5   :  { %1721 = vmatmul.mubr.msk.f32.gmra.mrb[6].mxu0 %vm85_vm3, %v2298_v30  ;;  %1863 = vmatmul.mubr.msk.f32.gmra.mrb[4].mxu1 %vm87_vm5, %v2298_v30 }
  0xb6   :  { %1999 = vmatpush1.bf16.msra.mxu1 %v1998_v47  ;;  %1865 = vmatprep.mubr.msk.f32.mxu1 %vm88_vm6, %v2298_v30 }
  0xb7   :  { %242 = vmatprep.mubr.f32.mxu0 %v2297_v6  ;;  %2001 = vmatprep.subr.bf16.mxu1 %v2000_v49  ;;  %v2522_v49 = vld [vmem:[%s2684_s4 + $0x2] ss:$0 sm:$0xff] }
  0xb8   :  { %2015 = vmatpush1.bf16.msra.mxu0 %v2462_v12 }
  0xb9   :  { %1722 = vmatmul.mubr.msk.f32.gmra.mrb[8].mxu0 %vm86_vm4, %v2298_v30  ;;  %1866 = vmatmul.mubr.msk.f32.gmra.mrb[6].mxu1 %vm89_vm7, %v2298_v30 }
  0xba   :  { %2003 = vmatpush1.bf16.msra.mxu1 %v2002_v53  ;;  %248 = vmatprep.mubr.f32.mxu0 %v2297_v6 }
  0xbb   :  { %493 = vmatprep.mubr.f32.mxu1 %v2297_v6  ;;  %2021 = vmatprep.subr.bf16.mxu1 %v2440_v58 }
  0xbc   :  { %2017 = vmatprep.subr.bf16.mxu0 %v2468_v17 }
  0xbd   :  { %1723 = vmatmul.mubr.msk.f32.gmra.mrb[10].mxu0 %vm87_vm5, %v2298_v30  ;;  %1734 = vmatmul.mubr.msk.f32.vlgmr.msra.gmra.mrb[8].mxu1 %vm425_vm8, %v396_v54 }
  0xbe   :  { %254 = vmatprep.mubr.f32.mxu0 %v2297_v6  ;;  %701 = vmatprep.mubr.f32.mxu1 %v2297_v6 }
  0xbf   :  { %2023 = vmatpush1.bf16.msra.mxu1 %v2442_v60  ;;  %2019 = vmatpush1.bf16.msra.mxu0 %v2470_v19 }
  0xc0   :  { %2025 = vmatprep.subr.bf16.mxu1 %v2448_v0  ;;  %2037 = vmatprep.subr.bf16.mxu0 %v2440_v58 }
  0xc1   :  { %1724 = vmatmul.mubr.msk.f32.gmra.mrb[12].mxu0 %vm88_vm6, %v2298_v30 }
  0xc2   :  { %260 = vmatprep.mubr.f32.mxu0 %v2297_v6 }
  0xc3   :  { %2027 = vmatpush1.bf16.msra.mxu1 %v2450_v2 }
  0xc4   :  { %2029 = vmatprep.subr.bf16.mxu1 %v2457_v9 }
  0xc5   :  { %1725 = vmatmul.mubr.msk.f32.gmra.mrb[14].mxu0 %vm89_vm7, %v2298_v30 }
  0xc6   :  { %590 = vmatprep.mubr.f32.mxu0 %v2297_v6 }
  0xc7   :  { %2031 = vmatpush1.bf16.msra.mxu1 %v2462_v12 }
  0xc8   :  { %2033 = vmatprep.subr.bf16.mxu1 %v2468_v17 }
  0xcb   :  { %2035 = vmatpush1.bf16.msra.mxu1 %v2470_v19 }
  0xcc   :  { %2053 = vmatprep.subr.bf16.mxu1 %v2440_v58 }
 0x17c   :  { %v220_v20 = vpop.f32.mrb[0].mxu0 }
 0x17d   :  { %v222_v21 = vpop.f32.mrb[1].mxu0 }
 0x180   :  { %v2478_v22 = vpop.f32.mrb[2].mxu0 }
 0x181   :  { %v2480_v23 = vpop.f32.mrb[3].mxu0 }
 0x184   :  { %v2482_v24 = vpop.f32.mrb[4].mxu0 }
 0x185   :  { %v2484_v25 = vpop.f32.mrb[5].mxu0 }
 0x188   :  { %v2486_v26 = vpop.f32.mrb[6].mxu0 }
 0x189   :  { %v2488_v27 = vpop.f32.mrb[7].mxu0 }
 0x18c   :  { %v2490_v29 = vpop.f32.mrb[8].mxu0 }
 0x18d   :  { %v2492_v30 = vpop.f32.mrb[9].mxu0 }
 0x190   :  { %v2494_v32 = vpop.f32.mrb[10].mxu0  ;;  %v495_v33 = vpop.f32.mrb[8].mxu1 }
 0x191   :  { %v2496_v34 = vadd.f32 %v495_v33, %v418_v13  ;;  %v2498_v35 = vpop.f32.mrb[11].mxu0  ;;  %v497_v36 = vpop.f32.mrb[9].mxu1 }
 0x192   :  { %v498_v37 = vadd.f32 %v497_v36, %v422_v31 }
 0x194   :  { %2192 = vtanh.f32 %v498_v37  ;;  %v2500_v38 = vpop.f32.mrb[12].mxu0 }
 0x195   :  { %v2502_v39 = vpop.f32.mrb[13].mxu0 }
 0x198   :  { %v2504_v40 = vpop.f32.mrb[14].mxu0 }
 0x199   :  { %v2506_v41 = vpop.f32.mrb[15].mxu0 }
 0x19e   :  { %v2193_v42 = vpop.eup %2192 }
 0x19f   :  { %620 = vrot.lane.b32.xlu1 %v2193_v42, %s2299_s12  ;;  %1735 = vmatmul.mubr.msk.f32.vlgmr.msra.gmra.mrb[16].mxu0 %vm425_vm8, %v2193_v42 }
 0x1a0   :  { %2039 = vmatpush1.bf16.msra.mxu0 %v2442_v60  ;;  %804 = vmatprep.mubr.f32.mxu0 %v2297_v6 }
 0x1a1   :  { %2041 = vmatprep.subr.bf16.mxu0 %v2448_v0 }
 0x1a4   :  { %2043 = vmatpush1.bf16.msra.mxu0 %v2450_v2 }
 0x1a5   :  { %2045 = vmatprep.subr.bf16.mxu0 %v2457_v9 }
 0x1a8   :  { %2047 = vmatpush1.bf16.msra.mxu0 %v2462_v12 }
 0x1a9   :  { %2049 = vmatprep.subr.bf16.mxu0 %v2468_v17 }
 0x1ac   :  { %2051 = vmatpush1.bf16.msra.mxu0 %v2470_v19 }
 0x1ad   :  { %2069 = vmatprep.subr.bf16.mxu0 %v2440_v58 }
 0x211   :  { %v621_v56 = vpop.permute.xlu1 %620 }
 0x272   :  { %v592_v43 = vpop.f32.mrb[16].mxu0 }
 0x273   :  { %v597_v44 = vadd.f32 %v592_v43, %v220_v20  ;;  %v594_v45 = vpop.f32.mrb[17].mxu0 }
 0x274   :  { %v610_v50 = vadd.f32 %v2522_v49, %v594_v45 }
 0x275   :  { %v1736_v46 = vmul.f32 -1.442695, %v597_v44 }
 0x277   :  { %2194 = vpow2.f32 %v1736_v46 }
 0x281   :  { %v2195_v47 = vpop.eup %2194 }
 0x282   :  { %v601_v48 = vadd.f32 1.0, %v2195_v47 }
 0x284   :  { %2196 = vrcp.f32 %v601_v48 }
 0x28e   :  { %v2197_v51 = vpop.eup %2196 }
 0x28f   :  { %v611_v52 = vmul.f32 %v2197_v51, %v610_v50  ;;  %v614_v55 = vsub.f32 1.0, %v2197_v51  ;;  %v623_v59 = vmul.f32 %v2197_v51, %v621_v56 }
 0x291   :  { %v612_v53 = vadd.f32 %v611_v52, %v222_v21 }
 0x293   :  { %2198 = vtanh.f32 %v612_v53 }
 0x29d   :  { %v2199_v54 = vpop.eup %2198 }
 0x29e   :  { %616 = vrot.lane.b32.xlu0 %v2199_v54, %s2299_s12 }
 0x310   :  { %v617_v57 = vpop.permute.xlu0 %616 }
 0x311   :  { %v619_v61 = vmul.f32 %v617_v57, %v614_v55 }
 0x313   :  { %v624_v62 = vadd.f32 %v623_v59, %v619_v61 }
 0x315   :  { %626 = vrot.lane.b32.xlu0 %v624_v62, %s2299_s12 }
 0x387   :  { %v627_v63 = vpop.permute.xlu0 %626 }
 0x388   :  { %629 = vst.msk [vmem:[#allocation3] sm:$0xff] %vm425_vm8, %v627_v63  ;;  %1738 = vmatmul.mubr.msk.f32.vlgmr.msra.gmra.mrb[10].mxu1 %vm425_vm8, %v627_v63 }
 0x389   :  { %2055 = vmatpush1.bf16.msra.mxu1 %v2442_v60  ;;  %907 = vmatprep.mubr.f32.mxu1 %v2297_v6 }
 0x38a   :  { %2057 = vmatprep.subr.bf16.mxu1 %v2448_v0 }
 0x38d   :  { %2059 = vmatpush1.bf16.msra.mxu1 %v2450_v2 }
 0x38e   :  { %2061 = vmatprep.subr.bf16.mxu1 %v2457_v9 }
 0x391   :  { %2063 = vmatpush1.bf16.msra.mxu1 %v2462_v12 }
 0x392   :  { %2065 = vmatprep.subr.bf16.mxu1 %v2468_v17 }
 0x395   :  { %2067 = vmatpush1.bf16.msra.mxu1 %v2470_v19 }
 0x396   :  { %2085 = vmatprep.subr.bf16.mxu1 %v2440_v58 }
 0x45b   :  { %v703_v1 = vpop.f32.mrb[10].mxu1 }
 0x45c   :  { %v708_v3 = vadd.f32 %v703_v1, %v2478_v22  ;;  %v705_v4 = vpop.f32.mrb[11].mxu1 }
 0x45d   :  { %v715_v10 = vadd.f32 %v2522_v49, %v705_v4 }
 0x45e   :  { %v1739_v5 = vmul.f32 -1.442695, %v708_v3 }
 0x460   :  { %2200 = vpow2.f32 %v1739_v5 }
 0x46a   :  { %v2201_v7 = vpop.eup %2200 }
 0x46b   :  { %v712_v8 = vadd.f32 1.0, %v2201_v7 }
 0x46d   :  { %2202 = vrcp.f32 %v712_v8 }
 0x477   :  { %v2203_v11 = vpop.eup %2202 }
 0x478   :  { %v716_v13 = vmul.f32 %v2203_v11, %v715_v10  ;;  %v719_v16 = vsub.f32 1.0, %v2203_v11  ;;  %v725_v20 = vmul.f32 %v2203_v11, %v624_v62 }
 0x47a   :  { %v717_v14 = vadd.f32 %v716_v13, %v2480_v23 }
 0x47c   :  { %2204 = vtanh.f32 %v717_v14 }
 0x486   :  { %v2205_v15 = vpop.eup %2204 }
 0x487   :  { %721 = vrot.lane.b32.xlu1 %v2205_v15, %s2299_s12 }
 0x4f9   :  { %v722_v18 = vpop.permute.xlu1 %721 }
 0x4fa   :  { %v724_v21 = vmul.f32 %v722_v18, %v719_v16 }
 0x4fc   :  { %v726_v22 = vadd.f32 %v725_v20, %v724_v21 }
 0x4fe   :  { %728 = vrot.lane.b32.xlu0 %v726_v22, %s2299_s12 }
 0x570   :  { %v729_v28 = vpop.permute.xlu0 %728 }
 0x571   :  { %732 = vst.msk [vmem:[#allocation3 + $0x8] sm:$0xff] %vm425_vm8, %v729_v28  ;;  %1740 = vmatmul.mubr.msk.f32.vlgmr.msra.gmra.mrb[18].mxu0 %vm425_vm8, %v729_v28 }
 0x572   :  { %2071 = vmatpush1.bf16.msra.mxu0 %v2442_v60  ;;  %1010 = vmatprep.mubr.f32.mxu0 %v2297_v6 }
 0x573   :  { %2073 = vmatprep.subr.bf16.mxu0 %v2448_v0 }
 0x576   :  { %2075 = vmatpush1.bf16.msra.mxu0 %v2450_v2 }
 0x577   :  { %2077 = vmatprep.subr.bf16.mxu0 %v2457_v9 }
 0x57a   :  { %2079 = vmatpush1.bf16.msra.mxu0 %v2462_v12 }
 0x57b   :  { %2081 = vmatprep.subr.bf16.mxu0 %v2468_v17 }
 0x57e   :  { %2083 = vmatpush1.bf16.msra.mxu0 %v2470_v19 }
 0x57f   :  { %2101 = vmatprep.subr.bf16.mxu0 %v2440_v58 }
 0x644   :  { %v806_v23 = vpop.f32.mrb[18].mxu0 }
 0x645   :  { %v811_v31 = vadd.f32 %v806_v23, %v2482_v24  ;;  %v808_v33 = vpop.f32.mrb[19].mxu0 }
 0x646   :  { %v818_v43 = vadd.f32 %v2522_v49, %v808_v33 }
 0x647   :  { %v1741_v36 = vmul.f32 -1.442695, %v811_v31 }
 0x649   :  { %2206 = vpow2.f32 %v1741_v36 }
 0x653   :  { %v2207_v37 = vpop.eup %2206 }
 0x654   :  { %v815_v42 = vadd.f32 1.0, %v2207_v37 }
 0x656   :  { %2208 = vrcp.f32 %v815_v42 }
 0x660   :  { %v2209_v44 = vpop.eup %2208 }
 0x661   :  { %v819_v45 = vmul.f32 %v2209_v44, %v818_v43  ;;  %v822_v48 = vsub.f32 1.0, %v2209_v44  ;;  %v828_v51 = vmul.f32 %v2209_v44, %v726_v22 }
 0x663   :  { %v820_v46 = vadd.f32 %v819_v45, %v2484_v25 }
 0x665   :  { %2210 = vtanh.f32 %v820_v46 }
 0x66f   :  { %v2211_v47 = vpop.eup %2210 }
 0x670   :  { %824 = vrot.lane.b32.xlu1 %v2211_v47, %s2299_s12 }
 0x6e2   :  { %v825_v50 = vpop.permute.xlu1 %824 }
 0x6e3   :  { %v827_v24 = vmul.f32 %v825_v50, %v822_v48 }
 0x6e5   :  { %v829_v52 = vadd.f32 %v828_v51, %v827_v24 }
 0x6e7   :  { %831 = vrot.lane.b32.xlu0 %v829_v52, %s2299_s12 }
 0x759   :  { %v832_v53 = vpop.permute.xlu0 %831 }
 0x75a   :  { %835 = vst.msk [vmem:[#allocation3 + $0x10] sm:$0xff] %vm425_vm8, %v832_v53  ;;  %1742 = vmatmul.mubr.msk.f32.vlgmr.msra.gmra.mrb[12].mxu1 %vm425_vm8, %v832_v53 }
 0x75b   :  { %2087 = vmatpush1.bf16.msra.mxu1 %v2442_v60  ;;  %1113 = vmatprep.mubr.f32.mxu1 %v2297_v6 }
 0x75c   :  { %2089 = vmatprep.subr.bf16.mxu1 %v2448_v0 }
 0x75f   :  { %2091 = vmatpush1.bf16.msra.mxu1 %v2450_v2 }
 0x760   :  { %2093 = vmatprep.subr.bf16.mxu1 %v2457_v9 }
 0x763   :  { %2095 = vmatpush1.bf16.msra.mxu1 %v2462_v12 }
 0x764   :  { %2097 = vmatprep.subr.bf16.mxu1 %v2468_v17 }
 0x767   :  { %2099 = vmatpush1.bf16.msra.mxu1 %v2470_v19 }
 0x768   :  { %2117 = vmatprep.subr.bf16.mxu1 %v2440_v58 }
 0x82d   :  { %v909_v25 = vpop.f32.mrb[12].mxu1 }
 0x82e   :  { %v914_v54 = vadd.f32 %v909_v25, %v2486_v26  ;;  %v911_v55 = vpop.f32.mrb[13].mxu1 }
 0x82f   :  { %v921_v61 = vadd.f32 %v2522_v49, %v911_v55 }
 0x830   :  { %v1743_v56 = vmul.f32 -1.442695, %v914_v54 }
 0x832   :  { %2212 = vpow2.f32 %v1743_v56  ;;  %v1359_v56 = vld [vmem:[#allocation6 + $0x20] sm:$0xff] }
 0x83c   :  { %v2213_v57 = vpop.eup %2212 }
 0x83d   :  { %v918_v59 = vadd.f32 1.0, %v2213_v57  ;;  %v1360_v57 = vld [vmem:[#allocation6 + $0x50] sm:$0xff] }
 0x83f   :  { %2214 = vrcp.f32 %v918_v59  ;;  %v2132_v59 = vpack.c.bf16 %v1360_v57, %v1359_v56 }
 0x849   :  { %v2215_v62 = vpop.eup %2214 }
 0x84a   :  { %v922_v63 = vmul.f32 %v2215_v62, %v921_v61  ;;  %v925_v58 = vsub.f32 1.0, %v2215_v62  ;;  %v931_v5 = vmul.f32 %v2215_v62, %v829_v52 }
 0x84c   :  { %v923_v1 = vadd.f32 %v922_v63, %v2488_v27 }
 0x84e   :  { %2216 = vtanh.f32 %v923_v1 }
 0x858   :  { %v2217_v3 = vpop.eup %2216 }
 0x859   :  { %927 = vrot.lane.b32.xlu1 %v2217_v3, %s2299_s12 }
 0x8cb   :  { %v928_v4 = vpop.permute.xlu1 %927 }
 0x8cc   :  { %v930_v26 = vmul.f32 %v928_v4, %v925_v58  ;;  %v1361_v58 = vld [vmem:[#allocation6 + $0x80] sm:$0xff]  ;;  %v1362_v4 = vld [vmem:[#allocation6 + $0xb0] sm:$0xff] }
 0x8ce   :  { %v932_v7 = vadd.f32 %v931_v5, %v930_v26  ;;  %v1363_v26 = vld [vmem:[#allocation6 + $0xe0] sm:$0xff] }
 0x8d0   :  { %934 = vrot.lane.b32.xlu0 %v932_v7, %s2299_s12 }
 0x942   :  { %v935_v8 = vpop.permute.xlu0 %934 }
 0x943   :  { %938 = vst.msk [vmem:[#allocation3 + $0x18] sm:$0xff] %vm425_vm8, %v935_v8  ;;  %1744 = vmatmul.mubr.msk.f32.vlgmr.msra.gmra.mrb[20].mxu0 %vm425_vm8, %v935_v8  ;;  %v1351_v8 = vld [vmem:[#allocation3] sm:$0xff] }
 0x944   :  { %2103 = vmatpush1.bf16.msra.mxu0 %v2442_v60  ;;  %1216 = vmatprep.mubr.f32.mxu0 %v2297_v6 }
 0x945   :  { %2105 = vmatprep.subr.bf16.mxu0 %v2448_v0 }
 0x948   :  { %2107 = vmatpush1.bf16.msra.mxu0 %v2450_v2 }
 0x949   :  { %2109 = vmatprep.subr.bf16.mxu0 %v2457_v9 }
 0x94c   :  { %2111 = vmatpush1.bf16.msra.mxu0 %v2462_v12 }
 0x94d   :  { %2113 = vmatprep.subr.bf16.mxu0 %v2468_v17 }
 0x950   :  { %2115 = vmatpush1.bf16.msra.mxu0 %v2470_v19 }
 0xa16   :  { %v1012_v27 = vpop.f32.mrb[20].mxu0 }
 0xa17   :  { %v1017_v10 = vadd.f32 %v1012_v27, %v2490_v29  ;;  %v1014_v11 = vpop.f32.mrb[21].mxu0 }
 0xa18   :  { %v1024_v16 = vadd.f32 %v2522_v49, %v1014_v11  ;;  %v1366_v11 = vld [vmem:[#allocation6 + $0x170] sm:$0xff] }
 0xa19   :  { %v1745_v13 = vmul.f32 -1.442695, %v1017_v10  ;;  %v1365_v10 = vld [vmem:[#allocation6 + $0x140] sm:$0xff] }
 0xa1b   :  { %2218 = vpow2.f32 %v1745_v13  ;;  %v2144_v13 = vpack.c.bf16 %v1366_v11, %v1365_v10 }
 0xa25   :  { %v2219_v14 = vpop.eup %2218 }
 0xa26   :  { %v1021_v15 = vadd.f32 1.0, %v2219_v14  ;;  %v1352_v14 = vld [vmem:[#allocation3 + $0x8] sm:$0xff] }
 0xa28   :  { %2220 = vrcp.f32 %v1021_v15  ;;  %v1353_v15 = vld [vmem:[#allocation3 + $0x10] sm:$0xff] }
 0xa32   :  { %v2221_v18 = vpop.eup %2220 }
 0xa33   :  { %v1025_v20 = vmul.f32 %v2221_v18, %v1024_v16  ;;  %v1028_v28 = vsub.f32 1.0, %v2221_v18  ;;  %v1034_v31 = vmul.f32 %v2221_v18, %v932_v7  ;;  %v1364_v7 = vld [vmem:[#allocation6 + $0x110] sm:$0xff]  ;;  %v1354_v16 = vld [vmem:[#allocation3 + $0x18] sm:$0xff] }
 0xa34   :  { %v2140_v27 = vpack.c.bf16 %v1364_v7, %v1363_v26 }
 0xa35   :  { %v1026_v21 = vadd.f32 %v1025_v20, %v2492_v30 }
 0xa37   :  { %2222 = vtanh.f32 %v1026_v21 }
 0xa41   :  { %v2223_v22 = vpop.eup %2222 }
 0xa42   :  { %1030 = vrot.lane.b32.xlu1 %v2223_v22, %s2299_s12 }
 0xab4   :  { %v1031_v23 = vpop.permute.xlu1 %1030 }
 0xab5   :  { %v1033_v29 = vmul.f32 %v1031_v23, %v1028_v28 }
 0xab7   :  { %v1035_v33 = vadd.f32 %v1034_v31, %v1033_v29 }
 0xab9   :  { %1037 = vrot.lane.b32.xlu0 %v1035_v33, %s2299_s12 }
 0xb2b   :  { %v1038_v36 = vpop.permute.xlu0 %1037 }
 0xb2c   :  { %1041 = vst.msk [vmem:[#allocation3 + $0x20] sm:$0xff] %vm425_vm8, %v1038_v36  ;;  %1746 = vmatmul.mubr.msk.f32.vlgmr.msra.gmra.mrb[14].mxu1 %vm425_vm8, %v1038_v36 }
 0xb2d   :  { %2119 = vmatpush1.bf16.msra.mxu1 %v2442_v60  ;;  %1319 = vmatprep.mubr.f32.mxu1 %v2297_v6 }
 0xb2e   :  { %2121 = vmatprep.subr.bf16.mxu1 %v2448_v0 }
 0xb31   :  { %2123 = vmatpush1.bf16.msra.mxu1 %v2450_v2 }
 0xb32   :  { %2125 = vmatprep.subr.bf16.mxu1 %v2457_v9 }
 0xb33   :  { %v1355_v18 = vld [vmem:[#allocation3 + $0x20] sm:$0xff] }
 0xb35   :  { %2127 = vmatpush1.bf16.msra.mxu1 %v2462_v12 }
 0xb36   :  { %2129 = vmatprep.subr.bf16.mxu1 %v2468_v17 }
 0xb39   :  { %2131 = vmatpush1.bf16.msra.mxu1 %v2470_v19 }
 0xb3a   :  { %2133 = vmatprep.subr.bf16.mxu1 %v2132_v59 }
 0xbff   :  { %v1115_v30 = vpop.f32.mrb[14].mxu1 }
 0xc00   :  { %v1120_v37 = vadd.f32 %v1115_v30, %v2494_v32  ;;  %v1117_v42 = vpop.f32.mrb[15].mxu1 }
 0xc01   :  { %v1127_v0 = vadd.f32 %v2522_v49, %v1117_v42 }
 0xc02   :  { %v1747_v43 = vmul.f32 -1.442695, %v1120_v37 }
 0xc04   :  { %2224 = vpow2.f32 %v1747_v43 }
 0xc0e   :  { %v2225_v60 = vpop.eup %2224 }
 0xc0f   :  { %v1124_v6 = vadd.f32 1.0, %v2225_v60 }
 0xc11   :  { %2226 = vrcp.f32 %v1124_v6 }
 0xc1b   :  { %v2227_v2 = vpop.eup %2226 }
 0xc1c   :  { %v1128_v44 = vmul.f32 %v2227_v2, %v1127_v0  ;;  %v1131_v17 = vsub.f32 1.0, %v2227_v2  ;;  %v1137_v45 = vmul.f32 %v2227_v2, %v1035_v33 }
 0xc1e   :  { %v1129_v9 = vadd.f32 %v1128_v44, %v2498_v35 }
 0xc20   :  { %2228 = vtanh.f32 %v1129_v9 }
 0xc2a   :  { %v2229_v12 = vpop.eup %2228 }
 0xc2b   :  { %1133 = vrot.lane.b32.xlu1 %v2229_v12, %s2299_s12  ;;  %v1552_v12 = vld [vmem:[#allocation6 + $0x28] sm:$0xff] }
 0xc9d   :  { %v1134_v19 = vpop.permute.xlu1 %1133 }
 0xc9e   :  { %v1136_v32 = vmul.f32 %v1134_v19, %v1131_v17  ;;  %v1553_v17 = vld [vmem:[#allocation6 + $0x58] sm:$0xff]  ;;  %v1554_v19 = vld [vmem:[#allocation6 + $0x88] sm:$0xff] }
 0xca0   :  { %v1138_v46 = vadd.f32 %v1137_v45, %v1136_v32  ;;  %v2148_v45 = vpack.c.bf16 %v1553_v17, %v1552_v12  ;;  %v1555_v32 = vld [vmem:[#allocation6 + $0xb8] sm:$0xff] }
 0xca2   :  { %1140 = vrot.lane.b32.xlu0 %v1138_v46, %s2299_s12  ;;  %2149 = vmatprep.subr.bf16.mxu0 %v2148_v45 }
 0xd14   :  { %v1141_v47 = vpop.permute.xlu0 %1140 }
 0xd15   :  { %1144 = vst.msk [vmem:[#allocation3 + $0x28] sm:$0xff] %vm425_vm8, %v1141_v47  ;;  %1748 = vmatmul.mubr.msk.f32.vlgmr.msra.gmra.mrb[22].mxu0 %vm425_vm8, %v1141_v47  ;;  %v1556_v47 = vld [vmem:[#allocation6 + $0xe8] sm:$0xff] }
 0xd16   :  { %2151 = vmatpush3.bf16.msra.mxu0 %v2148_v45 }
 0xd1c   :  { %v1356_v20 = vld [vmem:[#allocation3 + $0x28] sm:$0xff] }
 0xde8   :  { %v1218_v48 = vpop.f32.mrb[22].mxu0 }
 0xde9   :  { %v1223_v50 = vadd.f32 %v1218_v48, %v2500_v38  ;;  %v1220_v35 = vpop.f32.mrb[23].mxu0 }
 0xdea   :  { %v1230_v53 = vadd.f32 %v2522_v49, %v1220_v35  ;;  %v1558_v35 = vld [vmem:[#allocation6 + $0x148] sm:$0xff] }
 0xdeb   :  { %v1749_v51 = vmul.f32 -1.442695, %v1223_v50 }
 0xded   :  { %2230 = vpow2.f32 %v1749_v51  ;;  %v1559_v51 = vld [vmem:[#allocation6 + $0x178] sm:$0xff] }
 0xdf7   :  { %v2231_v24 = vpop.eup %2230 }
 0xdf8   :  { %v1227_v52 = vadd.f32 1.0, %v2231_v24  ;;  %v2160_v24 = vpack.c.bf16 %v1559_v51, %v1558_v35 }
 0xdfa   :  { %2232 = vrcp.f32 %v1227_v52 }
 0xe04   :  { %v2233_v25 = vpop.eup %2232 }
 0xe05   :  { %v1231_v54 = vmul.f32 %v2233_v25, %v1230_v53  ;;  %v1234_v38 = vsub.f32 1.0, %v2233_v25  ;;  %v1240_v63 = vmul.f32 %v2233_v25, %v1138_v46  ;;  %v2152_v46 = vpack.c.bf16 %v1555_v32, %v1554_v19 }
 0xe07   :  { %v1232_v55 = vadd.f32 %v1231_v54, %v2502_v39  ;;  %v2136_v39 = vpack.c.bf16 %v1362_v4, %v1361_v58  ;;  %2153 = vmatprep.subr.bf16.mxu0 %v2152_v46 }
 0xe08   :  { %2155 = vmatpush3.bf16.msra.mxu0 %v2152_v46 }
 0xe09   :  { %2234 = vtanh.f32 %v1232_v55 }
 0xe13   :  { %v2235_v61 = vpop.eup %2234 }
 0xe14   :  { %1236 = vrot.lane.b32.xlu1 %v2235_v61, %s2299_s12 }
 0xe86   :  { %v1237_v62 = vpop.permute.xlu1 %1236 }
 0xe87   :  { %v1239_v1 = vmul.f32 %v1237_v62, %v1234_v38 }
 0xe89   :  { %v2611_v3 = vadd.f32 %v1240_v63, %v1239_v1 }
 0xe8b   :  { %1243 = vrot.lane.b32.xlu0 %v2611_v3, %s2299_s12 }
 0xefd   :  { %v1244_v5 = vpop.permute.xlu0 %1243 }
 0xefe   :  { %1247 = vst.msk [vmem:[#allocation3 + $0x30] sm:$0xff] %vm425_vm8, %v1244_v5  ;;  %1750 = vmatmul.mubr.msk.f32.vlgmr.msra.gmra.mrb[16].mxu1 %vm425_vm8, %v1244_v5 }
 0xeff   :  { %2135 = vmatpush3.bf16.msra.mxu1 %v2132_v59  ;;  %1884 = vmatprep.mubr.msk.f32.mxu1 %vm425_vm8, %v1351_v8 }
 0xf00   :  { %2137 = vmatprep.subr.bf16.mxu1 %v2136_v39 }
 0xf03   :  { %2139 = vmatpush3.bf16.msra.mxu1 %v2136_v39 }
 0xf04   :  { %2141 = vmatprep.subr.bf16.mxu1 %v2140_v27 }
 0xf05   :  { %v1357_v21 = vld [vmem:[#allocation3 + $0x30] sm:$0xff] }
 0xf07   :  { %2143 = vmatpush3.bf16.msra.mxu1 %v2140_v27 }
 0xf08   :  { %2145 = vmatprep.subr.bf16.mxu1 %v2144_v13 }
 0xf0b   :  { %2147 = vmatpush3.bf16.msra.mxu1 %v2144_v13 }
 0xf0e   :  { %1885 = vmatmul.mubr.msk.f32.vlgmr.msra.gmra.mrb[0].mxu1 %vm425_vm8, %v1352_v14 }
 0xf0f   :  { %1887 = vmatprep.mubr.msk.f32.mxu1 %vm425_vm8, %v1353_v15 }
 0xf12   :  { %1888 = vmatmul.mubr.msk.f32.gmra.mrb[2].mxu1 %vm425_vm8, %v1354_v16 }
 0xf13   :  { %1890 = vmatprep.mubr.msk.f32.mxu1 %vm425_vm8, %v1355_v18 }
 0xf16   :  { %1891 = vmatmul.mubr.msk.f32.gmra.mrb[4].mxu1 %vm425_vm8, %v1356_v20 }
 0xf17   :  { %1893 = vmatprep.mubr.msk.f32.mxu1 %vm425_vm8, %v1357_v21 }
 0xfd1   :  { %v1321_v22 = vpop.f32.mrb[16].mxu1 }
 0xfd2   :  { %v1326_v28 = vadd.f32 %v1321_v22, %v2504_v40  ;;  %v1323_v23 = vpop.f32.mrb[17].mxu1 }
 0xfd3   :  { %v1333_v6 = vadd.f32 %v2522_v49, %v1323_v23  ;;  %v1557_v49 = vld [vmem:[#allocation6 + $0x118] sm:$0xff] }
 0xfd4   :  { %v1751_v31 = vmul.f32 -1.442695, %v1326_v28 }
 0xfd6   :  { %2236 = vpow2.f32 %v1751_v31 }
 0xfe0   :  { %v2237_v29 = vpop.eup %2236 }
 0xfe1   :  { %v1330_v33 = vadd.f32 1.0, %v2237_v29  ;;  %v1886_v36 = vpop.f32.mrb[0].mxu1 }
 0xfe2   :  { %v1465_v30 = vpop.f32.mrb[1].mxu1  ;;  %v1471_v59 = vadd.f32 %v1886_v36, %v2496_v34 }
 0xfe3   :  { %2238 = vrcp.f32 %v1330_v33  ;;  %v1466_v9 = vadd.f32 %v1465_v30, %v2496_v34 }
 0xfe5   :  { %v1889_v37 = vpop.f32.mrb[2].mxu1 }
 0xfe6   :  { %v1475_v42 = vpop.f32.mrb[3].mxu1  ;;  %v1481_v61 = vadd.f32 %v1889_v37, %v2496_v34 }
 0xfe7   :  { %v1476_v48 = vadd.f32 %v1475_v42, %v2496_v34 }
 0xfe9   :  { %v1892_v43 = vpop.f32.mrb[4].mxu1 }
 0xfea   :  { %v1485_v60 = vpop.f32.mrb[5].mxu1  ;;  %v1491_v38 = vadd.f32 %v1892_v43, %v2496_v34 }
 0xfeb   :  { %v1486_v50 = vadd.f32 %v1485_v60, %v2496_v34 }
 0xfed   :  { %v2239_v0 = vpop.eup %2238 }
 0xfee   :  { %v1334_v2 = vmul.f32 %v2239_v0, %v1333_v6  ;;  %v1337_v52 = vsub.f32 1.0, %v2239_v0  ;;  %v1343_v25 = vmul.f32 %v2239_v0, %v2611_v3 }
 0xff0   :  { %v1335_v44 = vadd.f32 %v1334_v2, %v2506_v41  ;;  %v2156_v41 = vpack.c.bf16 %v1557_v49, %v1556_v47 }
 0xff2   :  { %2240 = vtanh.f32 %v1335_v44  ;;  %2157 = vmatprep.subr.bf16.mxu0 %v2156_v41 }
 0xff3   :  { %2159 = vmatpush3.bf16.msra.mxu0 %v2156_v41 }
 0xff4   :  { %2161 = vmatprep.subr.bf16.mxu0 %v2160_v24 }
 0xff7   :  { %2163 = vmatpush3.bf16.msra.mxu0 %v2160_v24 }
 0xffc   :  { %v2241_v40 = vpop.eup %2240 }
 0xffd   :  { %1339 = vrot.lane.b32.xlu1 %v2241_v40, %s2299_s12 }
0x1001   :  { %1520 = vrot.lane.b32.xlu1 %v1466_v9, %s2299_s12 }
0x1005   :  { %1524 = vrot.lane.b32.xlu1 %v1476_v48, %s2299_s12 }
0x1009   :  { %1528 = vrot.lane.b32.xlu1 %v1486_v50, %s2299_s12 }
0x106f   :  { %v1340_v53 = vpop.permute.xlu1 %1339 }
0x1070   :  { %v1342_v54 = vmul.f32 %v1340_v53, %v1337_v52 }
0x1072   :  { %v1344_v55 = vadd.f32 %v1343_v25, %v1342_v54 }
0x1073   :  { %v1521_v56 = vpop.permute.xlu1 %1520 }
0x1074   :  { %v1544_v57 = vmax.f32 %v1466_v9, %v1521_v56  ;;  %1346 = vrot.lane.b32.xlu0 %v1344_v55, %s2299_s12 }
0x1076   :  { %1912 = vmatprep.mubr.msk.f32.mxu0 %vm425_vm8, %v1544_v57 }
0x1077   :  { %v1525_v63 = vpop.permute.xlu1 %1524 }
0x1078   :  { %1522 = vrot.lane.b32.xlu0 %v1471_v59, %s2299_s12  ;;  %v1546_v58 = vmax.f32 %v1476_v48, %v1525_v63 }
0x107b   :  { %v1529_v4 = vpop.permute.xlu1 %1528 }
0x107c   :  { %1526 = vrot.lane.b32.xlu0 %v1481_v61, %s2299_s12  ;;  %v1548_v7 = vmax.f32 %v1486_v50, %v1529_v4 }
0x1080   :  { %1530 = vrot.lane.b32.xlu0 %v1491_v38, %s2299_s12 }
0x10e6   :  { %v1347_v62 = vpop.permute.xlu0 %1346 }
0x10e7   :  { %1350 = vst.msk [vmem:[#allocation3 + $0x38] sm:$0xff] %vm425_vm8, %v1347_v62 }
0x10ea   :  { %v1523_v1 = vpop.permute.xlu0 %1522 }
0x10eb   :  { %v1545_v3 = vmax.f32 %v1471_v59, %v1523_v1 }
0x10ed   :  { %1913 = vmatmul.mubr.msk.f32.vlgmr.msra.gmra.mrb[24].mxu0 %vm425_vm8, %v1545_v3 }
0x10ee   :  { %v1527_v39 = vpop.permute.xlu0 %1526  ;;  %1915 = vmatprep.mubr.msk.f32.mxu0 %vm425_vm8, %v1546_v58  ;;  %v1358_v5 = vld [vmem:[#allocation3 + $0x38] sm:$0xff] }
0x10ef   :  { %v1547_v26 = vmax.f32 %v1481_v61, %v1527_v39  ;;  %1894 = vmatmul.mubr.msk.f32.gmra.mrb[6].mxu1 %vm425_vm8, %v1358_v5 }
0x10f1   :  { %1916 = vmatmul.mubr.msk.f32.gmra.mrb[26].mxu0 %vm425_vm8, %v1547_v26 }
0x10f2   :  { %v1531_v8 = vpop.permute.xlu0 %1530  ;;  %1918 = vmatprep.mubr.msk.f32.mxu0 %vm425_vm8, %v1548_v7 }
0x10f3   :  { %v1549_v27 = vmax.f32 %v1491_v38, %v1531_v8 }
0x10f5   :  { %1919 = vmatmul.mubr.msk.f32.gmra.mrb[28].mxu0 %vm425_vm8, %v1549_v27 }
0x11c0   :  { %v1914_v10 = vpop.f32.mrb[24].mxu0 }
0x11c1   :  { %1690 = vst [vmem:[%s2685_s5 + $0x8] sm:$0xff] %v1914_v10  ;;  %v1650_v11 = vpop.f32.mrb[25].mxu0 }
0x11c2   :  { %1689 = vst [vmem:[%s2685_s5] sm:$0xff] %v1650_v11  ;;  %v1895_v13 = vpop.f32.mrb[6].mxu1 }
0x11c3   :  { %v1501_v14 = vadd.f32 %v1895_v13, %v2496_v34  ;;  %v1495_v15 = vpop.f32.mrb[7].mxu1 }
0x11c4   :  { %v1496_v16 = vadd.f32 %v1495_v15, %v2496_v34  ;;  %v1917_v18 = vpop.f32.mrb[26].mxu0 }
0x11c5   :  { %1692 = vst [vmem:[%s2685_s5 + $0x18] sm:$0xff] %v1917_v18  ;;  %1534 = vrot.lane.b32.xlu0 %v1501_v14, %s2299_s12  ;;  %v1660_v20 = vpop.f32.mrb[27].mxu0 }
0x11c6   :  { %1691 = vst [vmem:[%s2685_s5 + $0x10] sm:$0xff] %v1660_v20  ;;  %1532 = vrot.lane.b32.xlu1 %v1496_v16, %s2299_s12 }
0x11c8   :  { %v1920_v21 = vpop.f32.mrb[28].mxu0 }
0x11c9   :  { %1694 = vst [vmem:[%s2685_s5 + $0x28] sm:$0xff] %v1920_v21  ;;  %v1670_v34 = vpop.f32.mrb[29].mxu0 }
0x11ca   :  { %1693 = vst [vmem:[%s2685_s5 + $0x20] sm:$0xff] %v1670_v34 }
0x1237   :  { %v1535_v22 = vpop.permute.xlu0 %1534 }
0x1238   :  { %v1533_v28 = vpop.permute.xlu1 %1532  ;;  %v1551_v31 = vmax.f32 %v1501_v14, %v1535_v22 }
0x1239   :  { %v1550_v23 = vmax.f32 %v1496_v16, %v1533_v28 }
0x123b   :  { %1921 = vmatprep.mubr.msk.f32.mxu0 %vm425_vm8, %v1550_v23 }
0x123c   :  { %1922 = vmatmul.mubr.msk.f32.gmra.mrb[30].mxu0 %vm425_vm8, %v1551_v31 }
0x130f   :  { %v1923_v29 = vpop.f32.mrb[30].mxu0 }
0x1310   :  { %1696 = vst [vmem:[%s2685_s5 + $0x38] sm:$0xff] %v1923_v29  ;;  %v1680_v33 = vpop.f32.mrb[31].mxu0 }
0x1311   :  { %1695 = vst [vmem:[%s2685_s5 + $0x30] sm:$0xff] %v1680_v33 }
0x1312   :  { %1701 = vsyncpa [#allocation5], 1 }
0x1313   :  { %1702 = vsyncpa [#allocation7], 1 }

</bundles_post_ra>
